<compile_context>
chip_gen: v7x
topology: tpu7x:2x2x1
jax: 0.10.0
libtpu: 0.0.40
codegen_flags: <defaults>
</compile_context>

<pallas_src>
import functools

import jax
import jax.numpy as jnp
from jax.experimental import pallas as pl
from jax.experimental.pallas import tpu as pltpu

# ----------------------------- configuration --------------------------------
B, C, H, W = 2, 3, 16, 16          # small image, NCHW
P = 8                              # patch_size
HQ, WQ = H // P, W // P            # quantizer spatial grid
N_TOK = HQ * WQ                    # tokens per image
ENC_DIM = 32                       # encoder token dim (small "ViT")
HEADS = 4
HEAD_DIM = ENC_DIM // HEADS
MLP_DIM = 4 * ENC_DIM
DEPTH = 2                          # transformer blocks
LATENT_DIM = 32                    # latent_dim
CODEBOOK_SIZE = 64                 # codebook_size (small)
COMMIT_W = 1.0                     # commitment_weight
LN_EPS = 1e-6
CPP = C * P * P                    # flattened patch length (192)

# --------- packed-slab row layout (all offsets are compile-time ints) --------
# per-block matmul-weight slab: (DEPTH, WBLK_ROWS, 128), columns zero-padded
RB_WQKV = 0                        # (ENC, 3*ENC)   rows 0:32,   cols 0:96
RB_WPROJ = ENC_DIM                 # (ENC, ENC)     rows 32:64,  cols 0:32
RB_WMLP1 = 2 * ENC_DIM             # (ENC, MLP)     rows 64:96,  cols 0:128
RB_WMLP2 = 3 * ENC_DIM             # (MLP, ENC)     rows 96:224, cols 0:32
WBLK_ROWS = 3 * ENC_DIM + MLP_DIM  # 224

# global matmul-weight slab: (WGLOB_ROWS, 128)
RG_WPE = 0                         # patch embed    (CPP, ENC)
RG_WQP = CPP                       # quant_proj     (ENC, LATENT)
RG_CN = CPP + ENC_DIM              # codebook (L2-normalised) (K, LATENT)
WGLOB_ROWS = RG_CN + CODEBOOK_SIZE  # 288

# gains / biases / pos-emb slab: (VEC_ROWS, 128), one logical vector per row
RV_BPE, RV_LNF_G, RV_LNF_B, RV_BQP = 0, 1, 2, 3
RV_POS = 4                         # pos_emb rows (N_TOK of them)
RV_BLK0 = RV_POS + N_TOK
VEC_ROWS_PER_BLK = 8               # ln1_g ln1_b b_qkv b_proj ln2_g ln2_b b_mlp1 b_mlp2
VEC_ROWS = RV_BLK0 + DEPTH * VEC_ROWS_PER_BLK


# --------------------------- fused forward kernel ----------------------------
def _vq_fused_kernel(patches_ref, w_blk_ref, w_glob_ref, vecs_ref,
                     quant_ref, loss_ref, *,
                     depth, heads, head_dim, n_tok, enc_dim, mlp_dim,
                     latent_dim, cb_size):
    """One grid step = one image: patch-embed -> transformer -> quant_proj -> VQ."""
    f32 = jnp.float32

    def vrow(row, width):
        # one packed bias/gain row, shape (1, width); broadcasts over tokens
        return vecs_ref[row:row + 1, 0:width]

    def layernorm(x, g, b):
        mu = jnp.mean(x, axis=-1, keepdims=True)
        xc = x - mu
        var = jnp.mean(xc * xc, axis=-1, keepdims=True)
        return xc * jax.lax.rsqrt(var + LN_EPS) * g + b

    # --- patch embedding + positional embedding (no tiling: one image here) --
    w_pe = w_glob_ref[RG_WPE:RG_WPE + CPP, 0:enc_dim]
    tok = (jnp.dot(patches_ref[...], w_pe, preferred_element_type=f32)
           + vrow(RV_BPE, enc_dim)
           + vecs_ref[RV_POS:RV_POS + n_tok, 0:enc_dim])             # (N_TOK, ENC)

    scale = float(head_dim) ** -0.5
    # per-head lane masks, hoisted out of the depth loop (broadcasts aren't CSE'd)
    lane = jax.lax.broadcasted_iota(jnp.int32, (n_tok, enc_dim), 1)
    head_mask = [(lane >= hh * head_dim) & (lane < (hh + 1) * head_dim)
                 for hh in range(heads)]

    # --- transformer blocks (weights stacked along DEPTH in one slab) --------
    # TODO(synk): at production DEPTH switch to lax.fori_loop over the stacked
    # slabs so live ranges stay bounded (no vreg spills with big M-tiles).
    for d in range(depth):
        base = RV_BLK0 + d * VEC_ROWS_PER_BLK

        h1 = layernorm(tok, vrow(base + 0, enc_dim), vrow(base + 1, enc_dim))
        w_qkv = w_blk_ref[d, RB_WQKV:RB_WQKV + enc_dim, 0:3 * enc_dim]
        qkv = (jnp.dot(h1, w_qkv, preferred_element_type=f32)
               + vrow(base + 2, 3 * enc_dim))                 # (N_TOK, 3*ENC), registers

        # attention: all heads accumulated into lane slices of a (N_TOK, ENC)
        # register (V masked to the head's lanes), then ONE w_proj matmul.
        v_all = qkv[:, 2 * enc_dim:3 * enc_dim]               # (N_TOK, ENC)
        att = jnp.zeros((n_tok, enc_dim), f32)
        for hh in range(heads):
            c0 = hh * head_dim
            q = qkv[:, c0:c0 + head_dim]
            k = qkv[:, enc_dim + c0:enc_dim + c0 + head_dim]
            s = jax.lax.dot_general(q, k, (((1,), (1,)), ((), ())),
                                    preferred_element_type=f32) * scale
            s = s - jnp.max(s, axis=-1, keepdims=True)
            p = jnp.exp(s)
            p = p * pl.reciprocal(jnp.sum(p, axis=-1, keepdims=True), approx=True)
            v_h = jnp.where(head_mask[hh], v_all, 0.0)        # keep head-h lanes only
            att = att + jnp.dot(p, v_h, preferred_element_type=f32)
        w_proj = w_blk_ref[d, RB_WPROJ:RB_WPROJ + enc_dim, 0:enc_dim]
        tok = (tok + jnp.dot(att, w_proj, preferred_element_type=f32)
               + vrow(base + 3, enc_dim))                     # residual

        # MLP
        h2 = layernorm(tok, vrow(base + 4, enc_dim), vrow(base + 5, enc_dim))
        w_mlp1 = w_blk_ref[d, RB_WMLP1:RB_WMLP1 + enc_dim, 0:mlp_dim]
        h2 = jnp.dot(h2, w_mlp1, preferred_element_type=f32) + vrow(base + 6, mlp_dim)
        # TODO(synk): torch nn.GELU defaults to exact erf; tanh approximation used.
        h2 = jax.nn.gelu(h2, approximate=True)
        w_mlp2 = w_blk_ref[d, RB_WMLP2:RB_WMLP2 + mlp_dim, 0:enc_dim]
        tok = (tok + jnp.dot(h2, w_mlp2, preferred_element_type=f32)
               + vrow(base + 7, enc_dim))                     # residual

    tok = layernorm(tok, vrow(RV_LNF_G, enc_dim), vrow(RV_LNF_B, enc_dim))

    # --- quant_proj: Conv2d(enc_dim, latent_dim, 1) == per-token linear ------
    w_qp = w_glob_ref[RG_WQP:RG_WQP + enc_dim, 0:latent_dim]
    z = jnp.dot(tok, w_qp, preferred_element_type=f32) + vrow(RV_BQP, latent_dim)

    # --- cosine-sim VQ (lucid, norm_codes=True, norm_latents=False) ----------
    cn = w_glob_ref[RG_CN:RG_CN + cb_size, 0:latent_dim]      # pre-normalised codebook
    zn = z * jax.lax.rsqrt(jnp.sum(z * z, axis=-1, keepdims=True) + 1e-12)
    sim = jax.lax.dot_general(zn, cn, (((1,), (1,)), ((), ())),
                              preferred_element_type=f32)     # (N_TOK, K)
    iota_k = jax.lax.broadcasted_iota(jnp.int32, (n_tok, cb_size), 1)
    smax = jnp.max(sim, axis=-1, keepdims=True)
    idx = jnp.min(jnp.where(sim >= smax, iota_k, cb_size), axis=-1, keepdims=True)
    onehot = (iota_k == idx).astype(f32)                      # first-argmax
    quant = jnp.dot(onehot, cn, preferred_element_type=f32)   # (N_TOK, D_Q)
    # TODO(synk): at production sizes pad/pack quant's last dim to 128 lanes
    # (LATENT_DIM=32 lowers to a masked vst) and unpack in the wrapper.
    quant_ref[...] = quant                                    # straight-through fwd value

    # per-image sum of squared commitment error; commit_w * mean done in wrapper
    diff = quant - z
    ssq = jnp.sum(diff * diff, axis=-1, keepdims=True)        # (N_TOK, 1)
    loss_ref[...] = jnp.sum(ssq, axis=0, keepdims=True)       # (1, 1)


# ------------------------------ model params ---------------------------------
def init_params(key):
    keys = jax.random.split(key, 64)
    it = iter(keys)

    def w(shape, scale=0.02):
        return (scale * jax.random.normal(next(it), shape)).astype(jnp.float32)

    params = {
        "w_pe": w((CPP, ENC_DIM)),
        "b_pe": jnp.zeros((1, ENC_DIM), jnp.float32),
        "pos_emb": w((N_TOK, ENC_DIM)),
        "blocks": [],
        "lnf_g": jnp.ones((1, ENC_DIM), jnp.float32),
        "lnf_b": jnp.zeros((1, ENC_DIM), jnp.float32),
        "w_qp": w((ENC_DIM, LATENT_DIM)),            # quant_proj: 1x1 Conv2d
        "b_qp": jnp.zeros((1, LATENT_DIM), jnp.float32),
        "codebook": w((CODEBOOK_SIZE, LATENT_DIM), scale=1.0),
    }
    for _ in range(DEPTH):
        params["blocks"].append({
            "ln1_g": jnp.ones((1, ENC_DIM), jnp.float32),
            "ln1_b": jnp.zeros((1, ENC_DIM), jnp.float32),
            "w_qkv": w((ENC_DIM, 3 * ENC_DIM)),
            "b_qkv": jnp.zeros((1, 3 * ENC_DIM), jnp.float32),
            "w_proj": w((ENC_DIM, ENC_DIM)),
            "b_proj": jnp.zeros((1, ENC_DIM), jnp.float32),
            "ln2_g": jnp.ones((1, ENC_DIM), jnp.float32),
            "ln2_b": jnp.zeros((1, ENC_DIM), jnp.float32),
            "w_mlp1": w((ENC_DIM, MLP_DIM)),
            "b_mlp1": jnp.zeros((1, MLP_DIM), jnp.float32),
            "w_mlp2": w((MLP_DIM, ENC_DIM)),
            "b_mlp2": jnp.zeros((1, ENC_DIM), jnp.float32),
        })
    return params


def pack_params(params):
    """Pack all parameters into 3 lane-dense VMEM slabs (done once at setup)."""
    # per-block matmul weights, stacked along DEPTH
    blk_slabs = []
    for blk in params["blocks"]:
        s = jnp.zeros((WBLK_ROWS, 128), jnp.float32)
        s = s.at[RB_WQKV:RB_WQKV + ENC_DIM, 0:3 * ENC_DIM].set(blk["w_qkv"])
        s = s.at[RB_WPROJ:RB_WPROJ + ENC_DIM, 0:ENC_DIM].set(blk["w_proj"])
        s = s.at[RB_WMLP1:RB_WMLP1 + ENC_DIM, 0:MLP_DIM].set(blk["w_mlp1"])
        s = s.at[RB_WMLP2:RB_WMLP2 + MLP_DIM, 0:ENC_DIM].set(blk["w_mlp2"])
        blk_slabs.append(s)
    w_blk = jnp.stack(blk_slabs, axis=0)                       # (DEPTH, 224, 128)

    # global matmul weights (codebook L2-norm hoisted out of the kernel)
    cb = params["codebook"]
    cn = cb * jax.lax.rsqrt(jnp.sum(cb * cb, axis=-1, keepdims=True) + 1e-12)
    w_glob = jnp.zeros((WGLOB_ROWS, 128), jnp.float32)
    w_glob = w_glob.at[RG_WPE:RG_WPE + CPP, 0:ENC_DIM].set(params["w_pe"])
    w_glob = w_glob.at[RG_WQP:RG_WQP + ENC_DIM, 0:LATENT_DIM].set(params["w_qp"])
    w_glob = w_glob.at[RG_CN:RG_CN + CODEBOOK_SIZE, 0:LATENT_DIM].set(cn)

    # 1-D gains / biases / positional embedding, one logical vector per row
    vecs = jnp.zeros((VEC_ROWS, 128), jnp.float32)
    vecs = vecs.at[RV_BPE:RV_BPE + 1, 0:ENC_DIM].set(params["b_pe"])
    vecs = vecs.at[RV_LNF_G:RV_LNF_G + 1, 0:ENC_DIM].set(params["lnf_g"])
    vecs = vecs.at[RV_LNF_B:RV_LNF_B + 1, 0:ENC_DIM].set(params["lnf_b"])
    vecs = vecs.at[RV_BQP:RV_BQP + 1, 0:LATENT_DIM].set(params["b_qp"])
    vecs = vecs.at[RV_POS:RV_POS + N_TOK, 0:ENC_DIM].set(params["pos_emb"])
    for d, blk in enumerate(params["blocks"]):
        base = RV_BLK0 + d * VEC_ROWS_PER_BLK
        vecs = vecs.at[base + 0:base + 1, 0:ENC_DIM].set(blk["ln1_g"])
        vecs = vecs.at[base + 1:base + 2, 0:ENC_DIM].set(blk["ln1_b"])
        vecs = vecs.at[base + 2:base + 3, 0:3 * ENC_DIM].set(blk["b_qkv"])
        vecs = vecs.at[base + 3:base + 4, 0:ENC_DIM].set(blk["b_proj"])
        vecs = vecs.at[base + 4:base + 5, 0:ENC_DIM].set(blk["ln2_g"])
        vecs = vecs.at[base + 5:base + 6, 0:ENC_DIM].set(blk["ln2_b"])
        vecs = vecs.at[base + 6:base + 7, 0:MLP_DIM].set(blk["b_mlp1"])
        vecs = vecs.at[base + 7:base + 8, 0:ENC_DIM].set(blk["b_mlp2"])

    return {"w_blk": w_blk, "w_glob": w_glob, "vecs": vecs}


# ------------------------------ model forward --------------------------------
def vq_forward(x_nchw, packed):
    """VQ.forward: (quant, code_loss).  quant is NCHW (B, D_Q, H_Q, W_Q).
    TODO(synk): exact `vit_b_enc` architecture lives in external vq/vit_models.py;
    a scaled-down ViT-style encoder with the same structure is used here."""
    b = x_nchw.shape[0]
    # patchify glue: (B,C,HQ,P,WQ,P) -> (B,HQ,WQ,C,P,P) -> (B, N_TOK, C*P*P)
    patches = (x_nchw.reshape(b, C, HQ, P, WQ, P)
               .transpose(0, 2, 4, 1, 3, 5)
               .reshape(b, N_TOK, CPP))

    quant_bnd, loss_parts = pl.pallas_call(
        functools.partial(_vq_fused_kernel, depth=DEPTH, heads=HEADS,
                          head_dim=HEAD_DIM, n_tok=N_TOK, enc_dim=ENC_DIM,
                          mlp_dim=MLP_DIM, latent_dim=LATENT_DIM,
                          cb_size=CODEBOOK_SIZE),
        out_shape=(jax.ShapeDtypeStruct((b, N_TOK, LATENT_DIM), jnp.float32),
                   jax.ShapeDtypeStruct((b, 1, 1), jnp.float32)),
        grid=(b,),
        in_specs=[
            pl.BlockSpec((None, N_TOK, CPP), lambda i: (i, 0, 0)),     # per-image patches
            pl.BlockSpec((DEPTH, WBLK_ROWS, 128), lambda i: (0, 0, 0)),  # pinned weights
            pl.BlockSpec((WGLOB_ROWS, 128), lambda i: (0, 0)),
            pl.BlockSpec((VEC_ROWS, 128), lambda i: (0, 0)),
        ],
        out_specs=(
            pl.BlockSpec((None, N_TOK, LATENT_DIM), lambda i: (i, 0, 0)),
            pl.BlockSpec((None, 1, 1), lambda i: (i, 0, 0)),
        ),
        compiler_params=pltpu.CompilerParams(
            dimension_semantics=("parallel",)),    # image axis: no output revisits
    )(patches, packed["w_blk"], packed["w_glob"], packed["vecs"])

    quant = (quant_bnd.reshape(b, HQ, WQ, LATENT_DIM)
             .transpose(0, 3, 1, 2))                             # B D_Q H_Q W_Q
    code_loss = COMMIT_W * jnp.sum(loss_parts) / float(b * N_TOK * LATENT_DIM)
    return quant, code_loss


# ----------------------------------- main ------------------------------------
if __name__ == "__main__":
    key = jax.random.PRNGKey(0)
    k_param, k_x = jax.random.split(key)
    params = init_params(k_param)
    packed = pack_params(params)
    x = jax.random.normal(k_x, (B, C, H, W), dtype=jnp.float32)     # NCHW input

    quant, code_loss = jax.jit(vq_forward)(x, packed)
    jax.block_until_ready((quant, code_loss))

    assert quant.shape == (B, LATENT_DIM, HQ, WQ)
    assert code_loss.shape == ()
    print("KERNEL_OK")
</pallas_src>

<mosaic_0001>
module attributes {stable_mosaic.version = 11 : i64} {
  func.func @_vq_fused_kernel(%arg0: i32, %arg1: memref<1x4x192xf32, #tpu.memory_space<vmem>>, %arg2: memref<2x224x128xf32, #tpu.memory_space<vmem>>, %arg3: memref<288x128xf32, #tpu.memory_space<vmem>>, %arg4: memref<24x128xf32, #tpu.memory_space<vmem>>, %arg5: memref<1x4x32xf32, #tpu.memory_space<vmem>>, %arg6: memref<1x1x1xf32, #tpu.memory_space<vmem>>) attributes {dimension_semantics = [#tpu.dimension_semantics<parallel>], iteration_bounds = array<i64: 2>, scalar_prefetch = 0 : i64, scratch_operands = 0 : i64, tpu.core_type = #tpu.core_type<tc>, window_params = [{transform_indices = @transform_0, window_bounds = array<i64: 1, 4, 192>}, {pipeline_mode = #tpu.pipeline_mode<synchronous>, transform_indices = @transform_1, window_bounds = array<i64: 2, 224, 128>}, {pipeline_mode = #tpu.pipeline_mode<synchronous>, transform_indices = @transform_2, window_bounds = array<i64: 288, 128>}, {pipeline_mode = #tpu.pipeline_mode<synchronous>, transform_indices = @transform_3, window_bounds = array<i64: 24, 128>}, {transform_indices = @transform_4, window_bounds = array<i64: 1, 4, 32>}, {transform_indices = @transform_5, window_bounds = array<i64: 1, 1, 1>}]} {
    %c0 = arith.constant 0 : index
    %c0_0 = arith.constant 0 : index
    %0 = vector.load %arg3[%c0, %c0_0] : memref<288x128xf32, #tpu.memory_space<vmem>>, vector<192x32xf32>
    %c0_1 = arith.constant 0 : index
    %c0_2 = arith.constant 0 : index
    %c0_3 = arith.constant 0 : index
    %1 = vector.load %arg1[%c0_1, %c0_2, %c0_3] : memref<1x4x192xf32, #tpu.memory_space<vmem>>, vector<1x4x192xf32>
    %2 = vector.shape_cast %1 : vector<1x4x192xf32> to vector<4x192xf32>
    %cst = arith.constant dense<0.000000e+00> : vector<4x32xf32>
    %3 = tpu.matmul %2, %0, %cst {dimension_numbers = #tpu.dot_dimension_numbers<[1], [0], [0], [1], [0, 0, 1, 1], [], []>} : vector<4x192xf32>, vector<192x32xf32>, vector<4x32xf32> -> vector<4x32xf32>
    %c0_4 = arith.constant 0 : index
    %c0_5 = arith.constant 0 : index
    %4 = vector.load %arg4[%c0_4, %c0_5] : memref<24x128xf32, #tpu.memory_space<vmem>>, vector<1x32xf32>
    %5 = vector.broadcast %4 : vector<1x32xf32> to vector<4x32xf32>
    %6 = arith.addf %3, %5 : vector<4x32xf32>
    %c4 = arith.constant 4 : index
    %c0_6 = arith.constant 0 : index
    %7 = vector.load %arg4[%c4, %c0_6] : memref<24x128xf32, #tpu.memory_space<vmem>>, vector<4x32xf32>
    %8 = arith.addf %6, %7 : vector<4x32xf32>
    %9 = tpu.iota {dimensions = array<i32: 1>} : vector<4x32xi32>
    %c0_i32 = arith.constant 0 : i32
    %10 = vector.broadcast %c0_i32 : i32 to vector<4x32xi32>
    %11 = arith.cmpi sge, %9, %10 : vector<4x32xi32>
    %c8_i32 = arith.constant 8 : i32
    %12 = vector.broadcast %c8_i32 : i32 to vector<4x32xi32>
    %13 = arith.cmpi slt, %9, %12 : vector<4x32xi32>
    %14 = arith.andi %11, %13 : vector<4x32xi1>
    %c8_i32_7 = arith.constant 8 : i32
    %15 = vector.broadcast %c8_i32_7 : i32 to vector<4x32xi32>
    %16 = arith.cmpi sge, %9, %15 : vector<4x32xi32>
    %c16_i32 = arith.constant 16 : i32
    %17 = vector.broadcast %c16_i32 : i32 to vector<4x32xi32>
    %18 = arith.cmpi slt, %9, %17 : vector<4x32xi32>
    %19 = arith.andi %16, %18 : vector<4x32xi1>
    %c16_i32_8 = arith.constant 16 : i32
    %20 = vector.broadcast %c16_i32_8 : i32 to vector<4x32xi32>
    %21 = arith.cmpi sge, %9, %20 : vector<4x32xi32>
    %c24_i32 = arith.constant 24 : i32
    %22 = vector.broadcast %c24_i32 : i32 to vector<4x32xi32>
    %23 = arith.cmpi slt, %9, %22 : vector<4x32xi32>
    %24 = arith.andi %21, %23 : vector<4x32xi1>
    %c24_i32_9 = arith.constant 24 : i32
    %25 = vector.broadcast %c24_i32_9 : i32 to vector<4x32xi32>
    %26 = arith.cmpi sge, %9, %25 : vector<4x32xi32>
    %c32_i32 = arith.constant 32 : i32
    %27 = vector.broadcast %c32_i32 : i32 to vector<4x32xi32>
    %28 = arith.cmpi slt, %9, %27 : vector<4x32xi32>
    %29 = arith.andi %26, %28 : vector<4x32xi1>
    %c8 = arith.constant 8 : index
    %c0_10 = arith.constant 0 : index
    %30 = vector.load %arg4[%c8, %c0_10] : memref<24x128xf32, #tpu.memory_space<vmem>>, vector<1x32xf32>
    %c9 = arith.constant 9 : index
    %c0_11 = arith.constant 0 : index
    %31 = vector.load %arg4[%c9, %c0_11] : memref<24x128xf32, #tpu.memory_space<vmem>>, vector<1x32xf32>
    %cst_12 = arith.constant dense<0.000000e+00> : vector<4xf32>
    %32 = vector.multi_reduction <add>, %8, %cst_12 [1] : vector<4x32xf32> to vector<4xf32>
    %33 = vector.shape_cast %32 : vector<4xf32> to vector<4x1xf32>
    %cst_13 = arith.constant 3.200000e+01 : f32
    %34 = vector.broadcast %cst_13 : f32 to vector<4x1xf32>
    %35 = arith.divf %33, %34 : vector<4x1xf32>
    %36 = vector.broadcast %35 : vector<4x1xf32> to vector<4x32xf32>
    %37 = arith.subf %8, %36 : vector<4x32xf32>
    %38 = arith.mulf %37, %37 : vector<4x32xf32>
    %cst_14 = arith.constant dense<0.000000e+00> : vector<4xf32>
    %39 = vector.multi_reduction <add>, %38, %cst_14 [1] : vector<4x32xf32> to vector<4xf32>
    %40 = vector.shape_cast %39 : vector<4xf32> to vector<4x1xf32>
    %cst_15 = arith.constant 3.200000e+01 : f32
    %41 = vector.broadcast %cst_15 : f32 to vector<4x1xf32>
    %42 = arith.divf %40, %41 : vector<4x1xf32>
    %cst_16 = arith.constant 9.99999997E-7 : f32
    %43 = vector.broadcast %cst_16 : f32 to vector<4x1xf32>
    %44 = arith.addf %42, %43 : vector<4x1xf32>
    %45 = math.rsqrt %44 : vector<4x1xf32>
    %46 = vector.broadcast %45 : vector<4x1xf32> to vector<4x32xf32>
    %47 = arith.mulf %37, %46 : vector<4x32xf32>
    %48 = vector.broadcast %30 : vector<1x32xf32> to vector<4x32xf32>
    %49 = arith.mulf %47, %48 : vector<4x32xf32>
    %50 = vector.broadcast %31 : vector<1x32xf32> to vector<4x32xf32>
    %51 = arith.addf %49, %50 : vector<4x32xf32>
    %c0_17 = arith.constant 0 : index
    %c0_18 = arith.constant 0 : index
    %c0_19 = arith.constant 0 : index
    %52 = vector.load %arg2[%c0_17, %c0_18, %c0_19] : memref<2x224x128xf32, #tpu.memory_space<vmem>>, vector<1x32x96xf32>
    %53 = vector.shape_cast %52 : vector<1x32x96xf32> to vector<32x96xf32>
    %cst_20 = arith.constant dense<0.000000e+00> : vector<4x96xf32>
    %54 = tpu.matmul %51, %53, %cst_20 {dimension_numbers = #tpu.dot_dimension_numbers<[1], [0], [0], [1], [0, 0, 1, 1], [], []>} : vector<4x32xf32>, vector<32x96xf32>, vector<4x96xf32> -> vector<4x96xf32>
    %c10 = arith.constant 10 : index
    %c0_21 = arith.constant 0 : index
    %55 = vector.load %arg4[%c10, %c0_21] : memref<24x128xf32, #tpu.memory_space<vmem>>, vector<1x96xf32>
    %56 = vector.broadcast %55 : vector<1x96xf32> to vector<4x96xf32>
    %57 = arith.addf %54, %56 : vector<4x96xf32>
    %58 = vector.extract_strided_slice %57 {offsets = [0, 64], sizes = [4, 32], strides = [1, 1]} : vector<4x96xf32> to vector<4x32xf32>
    %cst_22 = arith.constant 0.000000e+00 : f32
    %59 = vector.broadcast %cst_22 : f32 to vector<4x32xf32>
    %60 = vector.extract_strided_slice %57 {offsets = [0, 0], sizes = [4, 8], strides = [1, 1]} : vector<4x96xf32> to vector<4x8xf32>
    %61 = vector.extract_strided_slice %57 {offsets = [0, 32], sizes = [4, 8], strides = [1, 1]} : vector<4x96xf32> to vector<4x8xf32>
    %cst_23 = arith.constant dense<0.000000e+00> : vector<4x4xf32>
    %62 = tpu.matmul %60, %61, %cst_23 {dimension_numbers = #tpu.dot_dimension_numbers<[1], [1], [0], [0], [0, 0, 1, 0], [], []>} : vector<4x8xf32>, vector<4x8xf32>, vector<4x4xf32> -> vector<4x4xf32>
    %cst_24 = arith.constant 0.353553385 : f32
    %63 = vector.broadcast %cst_24 : f32 to vector<4x4xf32>
    %64 = arith.mulf %62, %63 : vector<4x4xf32>
    %cst_25 = arith.constant dense<0xFF800000> : vector<4xf32>
    %65 = vector.multi_reduction <maximumf>, %64, %cst_25 [1] : vector<4x4xf32> to vector<4xf32>
    %66 = vector.shape_cast %65 : vector<4xf32> to vector<4x1xf32>
    %67 = vector.broadcast %66 : vector<4x1xf32> to vector<4x4xf32>
    %68 = arith.subf %64, %67 : vector<4x4xf32>
    %69 = math.exp %68 : vector<4x4xf32>
    %cst_26 = arith.constant dense<0.000000e+00> : vector<4xf32>
    %70 = vector.multi_reduction <add>, %69, %cst_26 [1] : vector<4x4xf32> to vector<4xf32>
    %71 = vector.shape_cast %70 : vector<4xf32> to vector<4x1xf32>
    %72 = tpu.reciprocal %71 {approx = true} : vector<4x1xf32> -> vector<4x1xf32>
    %73 = vector.broadcast %72 : vector<4x1xf32> to vector<4x4xf32>
    %74 = arith.mulf %69, %73 : vector<4x4xf32>
    %cst_27 = arith.constant 0.000000e+00 : f32
    %75 = vector.broadcast %cst_27 : f32 to vector<4x32xf32>
    %76 = arith.select %14, %58, %75 : vector<4x32xi1>, vector<4x32xf32>
    %cst_28 = arith.constant dense<0.000000e+00> : vector<4x32xf32>
    %77 = tpu.matmul %74, %76, %cst_28 {dimension_numbers = #tpu.dot_dimension_numbers<[1], [0], [0], [1], [0, 0, 1, 1], [], []>} : vector<4x4xf32>, vector<4x32xf32>, vector<4x32xf32> -> vector<4x32xf32>
    %78 = arith.addf %59, %77 : vector<4x32xf32>
    %79 = vector.extract_strided_slice %57 {offsets = [0, 8], sizes = [4, 8], strides = [1, 1]} : vector<4x96xf32> to vector<4x8xf32>
    %80 = vector.extract_strided_slice %57 {offsets = [0, 40], sizes = [4, 8], strides = [1, 1]} : vector<4x96xf32> to vector<4x8xf32>
    %cst_29 = arith.constant dense<0.000000e+00> : vector<4x4xf32>
    %81 = tpu.matmul %79, %80, %cst_29 {dimension_numbers = #tpu.dot_dimension_numbers<[1], [1], [0], [0], [0, 0, 1, 0], [], []>} : vector<4x8xf32>, vector<4x8xf32>, vector<4x4xf32> -> vector<4x4xf32>
    %cst_30 = arith.constant 0.353553385 : f32
    %82 = vector.broadcast %cst_30 : f32 to vector<4x4xf32>
    %83 = arith.mulf %81, %82 : vector<4x4xf32>
    %cst_31 = arith.constant dense<0xFF800000> : vector<4xf32>
    %84 = vector.multi_reduction <maximumf>, %83, %cst_31 [1] : vector<4x4xf32> to vector<4xf32>
    %85 = vector.shape_cast %84 : vector<4xf32> to vector<4x1xf32>
    %86 = vector.broadcast %85 : vector<4x1xf32> to vector<4x4xf32>
    %87 = arith.subf %83, %86 : vector<4x4xf32>
    %88 = math.exp %87 : vector<4x4xf32>
    %cst_32 = arith.constant dense<0.000000e+00> : vector<4xf32>
    %89 = vector.multi_reduction <add>, %88, %cst_32 [1] : vector<4x4xf32> to vector<4xf32>
    %90 = vector.shape_cast %89 : vector<4xf32> to vector<4x1xf32>
    %91 = tpu.reciprocal %90 {approx = true} : vector<4x1xf32> -> vector<4x1xf32>
    %92 = vector.broadcast %91 : vector<4x1xf32> to vector<4x4xf32>
    %93 = arith.mulf %88, %92 : vector<4x4xf32>
    %cst_33 = arith.constant 0.000000e+00 : f32
    %94 = vector.broadcast %cst_33 : f32 to vector<4x32xf32>
    %95 = arith.select %19, %58, %94 : vector<4x32xi1>, vector<4x32xf32>
    %cst_34 = arith.constant dense<0.000000e+00> : vector<4x32xf32>
    %96 = tpu.matmul %93, %95, %cst_34 {dimension_numbers = #tpu.dot_dimension_numbers<[1], [0], [0], [1], [0, 0, 1, 1], [], []>} : vector<4x4xf32>, vector<4x32xf32>, vector<4x32xf32> -> vector<4x32xf32>
    %97 = arith.addf %78, %96 : vector<4x32xf32>
    %98 = vector.extract_strided_slice %57 {offsets = [0, 16], sizes = [4, 8], strides = [1, 1]} : vector<4x96xf32> to vector<4x8xf32>
    %99 = vector.extract_strided_slice %57 {offsets = [0, 48], sizes = [4, 8], strides = [1, 1]} : vector<4x96xf32> to vector<4x8xf32>
    %cst_35 = arith.constant dense<0.000000e+00> : vector<4x4xf32>
    %100 = tpu.matmul %98, %99, %cst_35 {dimension_numbers = #tpu.dot_dimension_numbers<[1], [1], [0], [0], [0, 0, 1, 0], [], []>} : vector<4x8xf32>, vector<4x8xf32>, vector<4x4xf32> -> vector<4x4xf32>
    %cst_36 = arith.constant 0.353553385 : f32
    %101 = vector.broadcast %cst_36 : f32 to vector<4x4xf32>
    %102 = arith.mulf %100, %101 : vector<4x4xf32>
    %cst_37 = arith.constant dense<0xFF800000> : vector<4xf32>
    %103 = vector.multi_reduction <maximumf>, %102, %cst_37 [1] : vector<4x4xf32> to vector<4xf32>
    %104 = vector.shape_cast %103 : vector<4xf32> to vector<4x1xf32>
    %105 = vector.broadcast %104 : vector<4x1xf32> to vector<4x4xf32>
    %106 = arith.subf %102, %105 : vector<4x4xf32>
    %107 = math.exp %106 : vector<4x4xf32>
    %cst_38 = arith.constant dense<0.000000e+00> : vector<4xf32>
    %108 = vector.multi_reduction <add>, %107, %cst_38 [1] : vector<4x4xf32> to vector<4xf32>
    %109 = vector.shape_cast %108 : vector<4xf32> to vector<4x1xf32>
    %110 = tpu.reciprocal %109 {approx = true} : vector<4x1xf32> -> vector<4x1xf32>
    %111 = vector.broadcast %110 : vector<4x1xf32> to vector<4x4xf32>
    %112 = arith.mulf %107, %111 : vector<4x4xf32>
    %cst_39 = arith.constant 0.000000e+00 : f32
    %113 = vector.broadcast %cst_39 : f32 to vector<4x32xf32>
    %114 = arith.select %24, %58, %113 : vector<4x32xi1>, vector<4x32xf32>
    %cst_40 = arith.constant dense<0.000000e+00> : vector<4x32xf32>
    %115 = tpu.matmul %112, %114, %cst_40 {dimension_numbers = #tpu.dot_dimension_numbers<[1], [0], [0], [1], [0, 0, 1, 1], [], []>} : vector<4x4xf32>, vector<4x32xf32>, vector<4x32xf32> -> vector<4x32xf32>
    %116 = arith.addf %97, %115 : vector<4x32xf32>
    %117 = vector.extract_strided_slice %57 {offsets = [0, 24], sizes = [4, 8], strides = [1, 1]} : vector<4x96xf32> to vector<4x8xf32>
    %118 = vector.extract_strided_slice %57 {offsets = [0, 56], sizes = [4, 8], strides = [1, 1]} : vector<4x96xf32> to vector<4x8xf32>
    %cst_41 = arith.constant dense<0.000000e+00> : vector<4x4xf32>
    %119 = tpu.matmul %117, %118, %cst_41 {dimension_numbers = #tpu.dot_dimension_numbers<[1], [1], [0], [0], [0, 0, 1, 0], [], []>} : vector<4x8xf32>, vector<4x8xf32>, vector<4x4xf32> -> vector<4x4xf32>
    %cst_42 = arith.constant 0.353553385 : f32
    %120 = vector.broadcast %cst_42 : f32 to vector<4x4xf32>
    %121 = arith.mulf %119, %120 : vector<4x4xf32>
    %cst_43 = arith.constant dense<0xFF800000> : vector<4xf32>
    %122 = vector.multi_reduction <maximumf>, %121, %cst_43 [1] : vector<4x4xf32> to vector<4xf32>
    %123 = vector.shape_cast %122 : vector<4xf32> to vector<4x1xf32>
    %124 = vector.broadcast %123 : vector<4x1xf32> to vector<4x4xf32>
    %125 = arith.subf %121, %124 : vector<4x4xf32>
    %126 = math.exp %125 : vector<4x4xf32>
    %cst_44 = arith.constant dense<0.000000e+00> : vector<4xf32>
    %127 = vector.multi_reduction <add>, %126, %cst_44 [1] : vector<4x4xf32> to vector<4xf32>
    %128 = vector.shape_cast %127 : vector<4xf32> to vector<4x1xf32>
    %129 = tpu.reciprocal %128 {approx = true} : vector<4x1xf32> -> vector<4x1xf32>
    %130 = vector.broadcast %129 : vector<4x1xf32> to vector<4x4xf32>
    %131 = arith.mulf %126, %130 : vector<4x4xf32>
    %cst_45 = arith.constant 0.000000e+00 : f32
    %132 = vector.broadcast %cst_45 : f32 to vector<4x32xf32>
    %133 = arith.select %29, %58, %132 : vector<4x32xi1>, vector<4x32xf32>
    %cst_46 = arith.constant dense<0.000000e+00> : vector<4x32xf32>
    %134 = tpu.matmul %131, %133, %cst_46 {dimension_numbers = #tpu.dot_dimension_numbers<[1], [0], [0], [1], [0, 0, 1, 1], [], []>} : vector<4x4xf32>, vector<4x32xf32>, vector<4x32xf32> -> vector<4x32xf32>
    %135 = arith.addf %116, %134 : vector<4x32xf32>
    %c0_47 = arith.constant 0 : index
    %c32 = arith.constant 32 : index
    %c0_48 = arith.constant 0 : index
    %136 = vector.load %arg2[%c0_47, %c32, %c0_48] : memref<2x224x128xf32, #tpu.memory_space<vmem>>, vector<1x32x32xf32>
    %137 = vector.shape_cast %136 : vector<1x32x32xf32> to vector<32x32xf32>
    %cst_49 = arith.constant dense<0.000000e+00> : vector<4x32xf32>
    %138 = tpu.matmul %135, %137, %cst_49 {dimension_numbers = #tpu.dot_dimension_numbers<[1], [0], [0], [1], [0, 0, 1, 1], [], []>} : vector<4x32xf32>, vector<32x32xf32>, vector<4x32xf32> -> vector<4x32xf32>
    %139 = arith.addf %8, %138 : vector<4x32xf32>
    %c11 = arith.constant 11 : index
    %c0_50 = arith.constant 0 : index
    %140 = vector.load %arg4[%c11, %c0_50] : memref<24x128xf32, #tpu.memory_space<vmem>>, vector<1x32xf32>
    %141 = vector.broadcast %140 : vector<1x32xf32> to vector<4x32xf32>
    %142 = arith.addf %139, %141 : vector<4x32xf32>
    %c12 = arith.constant 12 : index
    %c0_51 = arith.constant 0 : index
    %143 = vector.load %arg4[%c12, %c0_51] : memref<24x128xf32, #tpu.memory_space<vmem>>, vector<1x32xf32>
    %c13 = arith.constant 13 : index
    %c0_52 = arith.constant 0 : index
    %144 = vector.load %arg4[%c13, %c0_52] : memref<24x128xf32, #tpu.memory_space<vmem>>, vector<1x32xf32>
    %cst_53 = arith.constant dense<0.000000e+00> : vector<4xf32>
    %145 = vector.multi_reduction <add>, %142, %cst_53 [1] : vector<4x32xf32> to vector<4xf32>
    %146 = vector.shape_cast %145 : vector<4xf32> to vector<4x1xf32>
    %cst_54 = arith.constant 3.200000e+01 : f32
    %147 = vector.broadcast %cst_54 : f32 to vector<4x1xf32>
    %148 = arith.divf %146, %147 : vector<4x1xf32>
    %149 = vector.broadcast %148 : vector<4x1xf32> to vector<4x32xf32>
    %150 = arith.subf %142, %149 : vector<4x32xf32>
    %151 = arith.mulf %150, %150 : vector<4x32xf32>
    %cst_55 = arith.constant dense<0.000000e+00> : vector<4xf32>
    %152 = vector.multi_reduction <add>, %151, %cst_55 [1] : vector<4x32xf32> to vector<4xf32>
    %153 = vector.shape_cast %152 : vector<4xf32> to vector<4x1xf32>
    %cst_56 = arith.constant 3.200000e+01 : f32
    %154 = vector.broadcast %cst_56 : f32 to vector<4x1xf32>
    %155 = arith.divf %153, %154 : vector<4x1xf32>
    %cst_57 = arith.constant 9.99999997E-7 : f32
    %156 = vector.broadcast %cst_57 : f32 to vector<4x1xf32>
    %157 = arith.addf %155, %156 : vector<4x1xf32>
    %158 = math.rsqrt %157 : vector<4x1xf32>
    %159 = vector.broadcast %158 : vector<4x1xf32> to vector<4x32xf32>
    %160 = arith.mulf %150, %159 : vector<4x32xf32>
    %161 = vector.broadcast %143 : vector<1x32xf32> to vector<4x32xf32>
    %162 = arith.mulf %160, %161 : vector<4x32xf32>
    %163 = vector.broadcast %144 : vector<1x32xf32> to vector<4x32xf32>
    %164 = arith.addf %162, %163 : vector<4x32xf32>
    %c0_58 = arith.constant 0 : index
    %c64 = arith.constant 64 : index
    %c0_59 = arith.constant 0 : index
    %165 = vector.load %arg2[%c0_58, %c64, %c0_59] : memref<2x224x128xf32, #tpu.memory_space<vmem>>, vector<1x32x128xf32>
    %166 = vector.shape_cast %165 : vector<1x32x128xf32> to vector<32x128xf32>
    %cst_60 = arith.constant dense<0.000000e+00> : vector<4x128xf32>
    %167 = tpu.matmul %164, %166, %cst_60 {dimension_numbers = #tpu.dot_dimension_numbers<[1], [0], [0], [1], [0, 0, 1, 1], [], []>} : vector<4x32xf32>, vector<32x128xf32>, vector<4x128xf32> -> vector<4x128xf32>
    %c14 = arith.constant 14 : index
    %c0_61 = arith.constant 0 : index
    %168 = vector.load %arg4[%c14, %c0_61] : memref<24x128xf32, #tpu.memory_space<vmem>>, vector<1x128xf32>
    %169 = vector.broadcast %168 : vector<1x128xf32> to vector<4x128xf32>
    %170 = arith.addf %167, %169 : vector<4x128xf32>
    %171 = arith.mulf %170, %170 : vector<4x128xf32>
    %172 = arith.mulf %170, %171 : vector<4x128xf32>
    %cst_62 = arith.constant 4.471500e-02 : f32
    %173 = vector.broadcast %cst_62 : f32 to vector<4x128xf32>
    %174 = arith.mulf %173, %172 : vector<4x128xf32>
    %175 = arith.addf %170, %174 : vector<4x128xf32>
    %cst_63 = arith.constant 0.797884583 : f32
    %176 = vector.broadcast %cst_63 : f32 to vector<4x128xf32>
    %177 = arith.mulf %176, %175 : vector<4x128xf32>
    %178 = math.tanh %177 : vector<4x128xf32>
    %cst_64 = arith.constant 1.000000e+00 : f32
    %179 = vector.broadcast %cst_64 : f32 to vector<4x128xf32>
    %180 = arith.addf %179, %178 : vector<4x128xf32>
    %cst_65 = arith.constant 5.000000e-01 : f32
    %181 = vector.broadcast %cst_65 : f32 to vector<4x128xf32>
    %182 = arith.mulf %181, %180 : vector<4x128xf32>
    %183 = arith.mulf %170, %182 : vector<4x128xf32>
    %c0_66 = arith.constant 0 : index
    %c96 = arith.constant 96 : index
    %c0_67 = arith.constant 0 : index
    %184 = vector.load %arg2[%c0_66, %c96, %c0_67] : memref<2x224x128xf32, #tpu.memory_space<vmem>>, vector<1x128x32xf32>
    %185 = vector.shape_cast %184 : vector<1x128x32xf32> to vector<128x32xf32>
    %cst_68 = arith.constant dense<0.000000e+00> : vector<4x32xf32>
    %186 = tpu.matmul %183, %185, %cst_68 {dimension_numbers = #tpu.dot_dimension_numbers<[1], [0], [0], [1], [0, 0, 1, 1], [], []>} : vector<4x128xf32>, vector<128x32xf32>, vector<4x32xf32> -> vector<4x32xf32>
    %187 = arith.addf %142, %186 : vector<4x32xf32>
    %c15 = arith.constant 15 : index
    %c0_69 = arith.constant 0 : index
    %188 = vector.load %arg4[%c15, %c0_69] : memref<24x128xf32, #tpu.memory_space<vmem>>, vector<1x32xf32>
    %189 = vector.broadcast %188 : vector<1x32xf32> to vector<4x32xf32>
    %190 = arith.addf %187, %189 : vector<4x32xf32>
    %c16 = arith.constant 16 : index
    %c0_70 = arith.constant 0 : index
    %191 = vector.load %arg4[%c16, %c0_70] : memref<24x128xf32, #tpu.memory_space<vmem>>, vector<1x32xf32>
    %c17 = arith.constant 17 : index
    %c0_71 = arith.constant 0 : index
    %192 = vector.load %arg4[%c17, %c0_71] : memref<24x128xf32, #tpu.memory_space<vmem>>, vector<1x32xf32>
    %cst_72 = arith.constant dense<0.000000e+00> : vector<4xf32>
    %193 = vector.multi_reduction <add>, %190, %cst_72 [1] : vector<4x32xf32> to vector<4xf32>
    %194 = vector.shape_cast %193 : vector<4xf32> to vector<4x1xf32>
    %cst_73 = arith.constant 3.200000e+01 : f32
    %195 = vector.broadcast %cst_73 : f32 to vector<4x1xf32>
    %196 = arith.divf %194, %195 : vector<4x1xf32>
    %197 = vector.broadcast %196 : vector<4x1xf32> to vector<4x32xf32>
    %198 = arith.subf %190, %197 : vector<4x32xf32>
    %199 = arith.mulf %198, %198 : vector<4x32xf32>
    %cst_74 = arith.constant dense<0.000000e+00> : vector<4xf32>
    %200 = vector.multi_reduction <add>, %199, %cst_74 [1] : vector<4x32xf32> to vector<4xf32>
    %201 = vector.shape_cast %200 : vector<4xf32> to vector<4x1xf32>
    %cst_75 = arith.constant 3.200000e+01 : f32
    %202 = vector.broadcast %cst_75 : f32 to vector<4x1xf32>
    %203 = arith.divf %201, %202 : vector<4x1xf32>
    %cst_76 = arith.constant 9.99999997E-7 : f32
    %204 = vector.broadcast %cst_76 : f32 to vector<4x1xf32>
    %205 = arith.addf %203, %204 : vector<4x1xf32>
    %206 = math.rsqrt %205 : vector<4x1xf32>
    %207 = vector.broadcast %206 : vector<4x1xf32> to vector<4x32xf32>
    %208 = arith.mulf %198, %207 : vector<4x32xf32>
    %209 = vector.broadcast %191 : vector<1x32xf32> to vector<4x32xf32>
    %210 = arith.mulf %208, %209 : vector<4x32xf32>
    %211 = vector.broadcast %192 : vector<1x32xf32> to vector<4x32xf32>
    %212 = arith.addf %210, %211 : vector<4x32xf32>
    %c1 = arith.constant 1 : index
    %c0_77 = arith.constant 0 : index
    %c0_78 = arith.constant 0 : index
    %213 = vector.load %arg2[%c1, %c0_77, %c0_78] : memref<2x224x128xf32, #tpu.memory_space<vmem>>, vector<1x32x96xf32>
    %214 = vector.shape_cast %213 : vector<1x32x96xf32> to vector<32x96xf32>
    %cst_79 = arith.constant dense<0.000000e+00> : vector<4x96xf32>
    %215 = tpu.matmul %212, %214, %cst_79 {dimension_numbers = #tpu.dot_dimension_numbers<[1], [0], [0], [1], [0, 0, 1, 1], [], []>} : vector<4x32xf32>, vector<32x96xf32>, vector<4x96xf32> -> vector<4x96xf32>
    %c18 = arith.constant 18 : index
    %c0_80 = arith.constant 0 : index
    %216 = vector.load %arg4[%c18, %c0_80] : memref<24x128xf32, #tpu.memory_space<vmem>>, vector<1x96xf32>
    %217 = vector.broadcast %216 : vector<1x96xf32> to vector<4x96xf32>
    %218 = arith.addf %215, %217 : vector<4x96xf32>
    %219 = vector.extract_strided_slice %218 {offsets = [0, 64], sizes = [4, 32], strides = [1, 1]} : vector<4x96xf32> to vector<4x32xf32>
    %cst_81 = arith.constant 0.000000e+00 : f32
    %220 = vector.broadcast %cst_81 : f32 to vector<4x32xf32>
    %221 = vector.extract_strided_slice %218 {offsets = [0, 0], sizes = [4, 8], strides = [1, 1]} : vector<4x96xf32> to vector<4x8xf32>
    %222 = vector.extract_strided_slice %218 {offsets = [0, 32], sizes = [4, 8], strides = [1, 1]} : vector<4x96xf32> to vector<4x8xf32>
    %cst_82 = arith.constant dense<0.000000e+00> : vector<4x4xf32>
    %223 = tpu.matmul %221, %222, %cst_82 {dimension_numbers = #tpu.dot_dimension_numbers<[1], [1], [0], [0], [0, 0, 1, 0], [], []>} : vector<4x8xf32>, vector<4x8xf32>, vector<4x4xf32> -> vector<4x4xf32>
    %cst_83 = arith.constant 0.353553385 : f32
    %224 = vector.broadcast %cst_83 : f32 to vector<4x4xf32>
    %225 = arith.mulf %223, %224 : vector<4x4xf32>
    %cst_84 = arith.constant dense<0xFF800000> : vector<4xf32>
    %226 = vector.multi_reduction <maximumf>, %225, %cst_84 [1] : vector<4x4xf32> to vector<4xf32>
    %227 = vector.shape_cast %226 : vector<4xf32> to vector<4x1xf32>
    %228 = vector.broadcast %227 : vector<4x1xf32> to vector<4x4xf32>
    %229 = arith.subf %225, %228 : vector<4x4xf32>
    %230 = math.exp %229 : vector<4x4xf32>
    %cst_85 = arith.constant dense<0.000000e+00> : vector<4xf32>
    %231 = vector.multi_reduction <add>, %230, %cst_85 [1] : vector<4x4xf32> to vector<4xf32>
    %232 = vector.shape_cast %231 : vector<4xf32> to vector<4x1xf32>
    %233 = tpu.reciprocal %232 {approx = true} : vector<4x1xf32> -> vector<4x1xf32>
    %234 = vector.broadcast %233 : vector<4x1xf32> to vector<4x4xf32>
    %235 = arith.mulf %230, %234 : vector<4x4xf32>
    %cst_86 = arith.constant 0.000000e+00 : f32
    %236 = vector.broadcast %cst_86 : f32 to vector<4x32xf32>
    %237 = arith.select %14, %219, %236 : vector<4x32xi1>, vector<4x32xf32>
    %cst_87 = arith.constant dense<0.000000e+00> : vector<4x32xf32>
    %238 = tpu.matmul %235, %237, %cst_87 {dimension_numbers = #tpu.dot_dimension_numbers<[1], [0], [0], [1], [0, 0, 1, 1], [], []>} : vector<4x4xf32>, vector<4x32xf32>, vector<4x32xf32> -> vector<4x32xf32>
    %239 = arith.addf %220, %238 : vector<4x32xf32>
    %240 = vector.extract_strided_slice %218 {offsets = [0, 8], sizes = [4, 8], strides = [1, 1]} : vector<4x96xf32> to vector<4x8xf32>
    %241 = vector.extract_strided_slice %218 {offsets = [0, 40], sizes = [4, 8], strides = [1, 1]} : vector<4x96xf32> to vector<4x8xf32>
    %cst_88 = arith.constant dense<0.000000e+00> : vector<4x4xf32>
    %242 = tpu.matmul %240, %241, %cst_88 {dimension_numbers = #tpu.dot_dimension_numbers<[1], [1], [0], [0], [0, 0, 1, 0], [], []>} : vector<4x8xf32>, vector<4x8xf32>, vector<4x4xf32> -> vector<4x4xf32>
    %cst_89 = arith.constant 0.353553385 : f32
    %243 = vector.broadcast %cst_89 : f32 to vector<4x4xf32>
    %244 = arith.mulf %242, %243 : vector<4x4xf32>
    %cst_90 = arith.constant dense<0xFF800000> : vector<4xf32>
    %245 = vector.multi_reduction <maximumf>, %244, %cst_90 [1] : vector<4x4xf32> to vector<4xf32>
    %246 = vector.shape_cast %245 : vector<4xf32> to vector<4x1xf32>
    %247 = vector.broadcast %246 : vector<4x1xf32> to vector<4x4xf32>
    %248 = arith.subf %244, %247 : vector<4x4xf32>
    %249 = math.exp %248 : vector<4x4xf32>
    %cst_91 = arith.constant dense<0.000000e+00> : vector<4xf32>
    %250 = vector.multi_reduction <add>, %249, %cst_91 [1] : vector<4x4xf32> to vector<4xf32>
    %251 = vector.shape_cast %250 : vector<4xf32> to vector<4x1xf32>
    %252 = tpu.reciprocal %251 {approx = true} : vector<4x1xf32> -> vector<4x1xf32>
    %253 = vector.broadcast %252 : vector<4x1xf32> to vector<4x4xf32>
    %254 = arith.mulf %249, %253 : vector<4x4xf32>
    %cst_92 = arith.constant 0.000000e+00 : f32
    %255 = vector.broadcast %cst_92 : f32 to vector<4x32xf32>
    %256 = arith.select %19, %219, %255 : vector<4x32xi1>, vector<4x32xf32>
    %cst_93 = arith.constant dense<0.000000e+00> : vector<4x32xf32>
    %257 = tpu.matmul %254, %256, %cst_93 {dimension_numbers = #tpu.dot_dimension_numbers<[1], [0], [0], [1], [0, 0, 1, 1], [], []>} : vector<4x4xf32>, vector<4x32xf32>, vector<4x32xf32> -> vector<4x32xf32>
    %258 = arith.addf %239, %257 : vector<4x32xf32>
    %259 = vector.extract_strided_slice %218 {offsets = [0, 16], sizes = [4, 8], strides = [1, 1]} : vector<4x96xf32> to vector<4x8xf32>
    %260 = vector.extract_strided_slice %218 {offsets = [0, 48], sizes = [4, 8], strides = [1, 1]} : vector<4x96xf32> to vector<4x8xf32>
    %cst_94 = arith.constant dense<0.000000e+00> : vector<4x4xf32>
    %261 = tpu.matmul %259, %260, %cst_94 {dimension_numbers = #tpu.dot_dimension_numbers<[1], [1], [0], [0], [0, 0, 1, 0], [], []>} : vector<4x8xf32>, vector<4x8xf32>, vector<4x4xf32> -> vector<4x4xf32>
    %cst_95 = arith.constant 0.353553385 : f32
    %262 = vector.broadcast %cst_95 : f32 to vector<4x4xf32>
    %263 = arith.mulf %261, %262 : vector<4x4xf32>
    %cst_96 = arith.constant dense<0xFF800000> : vector<4xf32>
    %264 = vector.multi_reduction <maximumf>, %263, %cst_96 [1] : vector<4x4xf32> to vector<4xf32>
    %265 = vector.shape_cast %264 : vector<4xf32> to vector<4x1xf32>
    %266 = vector.broadcast %265 : vector<4x1xf32> to vector<4x4xf32>
    %267 = arith.subf %263, %266 : vector<4x4xf32>
    %268 = math.exp %267 : vector<4x4xf32>
    %cst_97 = arith.constant dense<0.000000e+00> : vector<4xf32>
    %269 = vector.multi_reduction <add>, %268, %cst_97 [1] : vector<4x4xf32> to vector<4xf32>
    %270 = vector.shape_cast %269 : vector<4xf32> to vector<4x1xf32>
    %271 = tpu.reciprocal %270 {approx = true} : vector<4x1xf32> -> vector<4x1xf32>
    %272 = vector.broadcast %271 : vector<4x1xf32> to vector<4x4xf32>
    %273 = arith.mulf %268, %272 : vector<4x4xf32>
    %cst_98 = arith.constant 0.000000e+00 : f32
    %274 = vector.broadcast %cst_98 : f32 to vector<4x32xf32>
    %275 = arith.select %24, %219, %274 : vector<4x32xi1>, vector<4x32xf32>
    %cst_99 = arith.constant dense<0.000000e+00> : vector<4x32xf32>
    %276 = tpu.matmul %273, %275, %cst_99 {dimension_numbers = #tpu.dot_dimension_numbers<[1], [0], [0], [1], [0, 0, 1, 1], [], []>} : vector<4x4xf32>, vector<4x32xf32>, vector<4x32xf32> -> vector<4x32xf32>
    %277 = arith.addf %258, %276 : vector<4x32xf32>
    %278 = vector.extract_strided_slice %218 {offsets = [0, 24], sizes = [4, 8], strides = [1, 1]} : vector<4x96xf32> to vector<4x8xf32>
    %279 = vector.extract_strided_slice %218 {offsets = [0, 56], sizes = [4, 8], strides = [1, 1]} : vector<4x96xf32> to vector<4x8xf32>
    %cst_100 = arith.constant dense<0.000000e+00> : vector<4x4xf32>
    %280 = tpu.matmul %278, %279, %cst_100 {dimension_numbers = #tpu.dot_dimension_numbers<[1], [1], [0], [0], [0, 0, 1, 0], [], []>} : vector<4x8xf32>, vector<4x8xf32>, vector<4x4xf32> -> vector<4x4xf32>
    %cst_101 = arith.constant 0.353553385 : f32
    %281 = vector.broadcast %cst_101 : f32 to vector<4x4xf32>
    %282 = arith.mulf %280, %281 : vector<4x4xf32>
    %cst_102 = arith.constant dense<0xFF800000> : vector<4xf32>
    %283 = vector.multi_reduction <maximumf>, %282, %cst_102 [1] : vector<4x4xf32> to vector<4xf32>
    %284 = vector.shape_cast %283 : vector<4xf32> to vector<4x1xf32>
    %285 = vector.broadcast %284 : vector<4x1xf32> to vector<4x4xf32>
    %286 = arith.subf %282, %285 : vector<4x4xf32>
    %287 = math.exp %286 : vector<4x4xf32>
    %cst_103 = arith.constant dense<0.000000e+00> : vector<4xf32>
    %288 = vector.multi_reduction <add>, %287, %cst_103 [1] : vector<4x4xf32> to vector<4xf32>
    %289 = vector.shape_cast %288 : vector<4xf32> to vector<4x1xf32>
    %290 = tpu.reciprocal %289 {approx = true} : vector<4x1xf32> -> vector<4x1xf32>
    %291 = vector.broadcast %290 : vector<4x1xf32> to vector<4x4xf32>
    %292 = arith.mulf %287, %291 : vector<4x4xf32>
    %cst_104 = arith.constant 0.000000e+00 : f32
    %293 = vector.broadcast %cst_104 : f32 to vector<4x32xf32>
    %294 = arith.select %29, %219, %293 : vector<4x32xi1>, vector<4x32xf32>
    %cst_105 = arith.constant dense<0.000000e+00> : vector<4x32xf32>
    %295 = tpu.matmul %292, %294, %cst_105 {dimension_numbers = #tpu.dot_dimension_numbers<[1], [0], [0], [1], [0, 0, 1, 1], [], []>} : vector<4x4xf32>, vector<4x32xf32>, vector<4x32xf32> -> vector<4x32xf32>
    %296 = arith.addf %277, %295 : vector<4x32xf32>
    %c1_106 = arith.constant 1 : index
    %c32_107 = arith.constant 32 : index
    %c0_108 = arith.constant 0 : index
    %297 = vector.load %arg2[%c1_106, %c32_107, %c0_108] : memref<2x224x128xf32, #tpu.memory_space<vmem>>, vector<1x32x32xf32>
    %298 = vector.shape_cast %297 : vector<1x32x32xf32> to vector<32x32xf32>
    %cst_109 = arith.constant dense<0.000000e+00> : vector<4x32xf32>
    %299 = tpu.matmul %296, %298, %cst_109 {dimension_numbers = #tpu.dot_dimension_numbers<[1], [0], [0], [1], [0, 0, 1, 1], [], []>} : vector<4x32xf32>, vector<32x32xf32>, vector<4x32xf32> -> vector<4x32xf32>
    %300 = arith.addf %190, %299 : vector<4x32xf32>
    %c19 = arith.constant 19 : index
    %c0_110 = arith.constant 0 : index
    %301 = vector.load %arg4[%c19, %c0_110] : memref<24x128xf32, #tpu.memory_space<vmem>>, vector<1x32xf32>
    %302 = vector.broadcast %301 : vector<1x32xf32> to vector<4x32xf32>
    %303 = arith.addf %300, %302 : vector<4x32xf32>
    %c20 = arith.constant 20 : index
    %c0_111 = arith.constant 0 : index
    %304 = vector.load %arg4[%c20, %c0_111] : memref<24x128xf32, #tpu.memory_space<vmem>>, vector<1x32xf32>
    %c21 = arith.constant 21 : index
    %c0_112 = arith.constant 0 : index
    %305 = vector.load %arg4[%c21, %c0_112] : memref<24x128xf32, #tpu.memory_space<vmem>>, vector<1x32xf32>
    %cst_113 = arith.constant dense<0.000000e+00> : vector<4xf32>
    %306 = vector.multi_reduction <add>, %303, %cst_113 [1] : vector<4x32xf32> to vector<4xf32>
    %307 = vector.shape_cast %306 : vector<4xf32> to vector<4x1xf32>
    %cst_114 = arith.constant 3.200000e+01 : f32
    %308 = vector.broadcast %cst_114 : f32 to vector<4x1xf32>
    %309 = arith.divf %307, %308 : vector<4x1xf32>
    %310 = vector.broadcast %309 : vector<4x1xf32> to vector<4x32xf32>
    %311 = arith.subf %303, %310 : vector<4x32xf32>
    %312 = arith.mulf %311, %311 : vector<4x32xf32>
    %cst_115 = arith.constant dense<0.000000e+00> : vector<4xf32>
    %313 = vector.multi_reduction <add>, %312, %cst_115 [1] : vector<4x32xf32> to vector<4xf32>
    %314 = vector.shape_cast %313 : vector<4xf32> to vector<4x1xf32>
    %cst_116 = arith.constant 3.200000e+01 : f32
    %315 = vector.broadcast %cst_116 : f32 to vector<4x1xf32>
    %316 = arith.divf %314, %315 : vector<4x1xf32>
    %cst_117 = arith.constant 9.99999997E-7 : f32
    %317 = vector.broadcast %cst_117 : f32 to vector<4x1xf32>
    %318 = arith.addf %316, %317 : vector<4x1xf32>
    %319 = math.rsqrt %318 : vector<4x1xf32>
    %320 = vector.broadcast %319 : vector<4x1xf32> to vector<4x32xf32>
    %321 = arith.mulf %311, %320 : vector<4x32xf32>
    %322 = vector.broadcast %304 : vector<1x32xf32> to vector<4x32xf32>
    %323 = arith.mulf %321, %322 : vector<4x32xf32>
    %324 = vector.broadcast %305 : vector<1x32xf32> to vector<4x32xf32>
    %325 = arith.addf %323, %324 : vector<4x32xf32>
    %c1_118 = arith.constant 1 : index
    %c64_119 = arith.constant 64 : index
    %c0_120 = arith.constant 0 : index
    %326 = vector.load %arg2[%c1_118, %c64_119, %c0_120] : memref<2x224x128xf32, #tpu.memory_space<vmem>>, vector<1x32x128xf32>
    %327 = vector.shape_cast %326 : vector<1x32x128xf32> to vector<32x128xf32>
    %cst_121 = arith.constant dense<0.000000e+00> : vector<4x128xf32>
    %328 = tpu.matmul %325, %327, %cst_121 {dimension_numbers = #tpu.dot_dimension_numbers<[1], [0], [0], [1], [0, 0, 1, 1], [], []>} : vector<4x32xf32>, vector<32x128xf32>, vector<4x128xf32> -> vector<4x128xf32>
    %c22 = arith.constant 22 : index
    %c0_122 = arith.constant 0 : index
    %329 = vector.load %arg4[%c22, %c0_122] : memref<24x128xf32, #tpu.memory_space<vmem>>, vector<1x128xf32>
    %330 = vector.broadcast %329 : vector<1x128xf32> to vector<4x128xf32>
    %331 = arith.addf %328, %330 : vector<4x128xf32>
    %332 = arith.mulf %331, %331 : vector<4x128xf32>
    %333 = arith.mulf %331, %332 : vector<4x128xf32>
    %cst_123 = arith.constant 4.471500e-02 : f32
    %334 = vector.broadcast %cst_123 : f32 to vector<4x128xf32>
    %335 = arith.mulf %334, %333 : vector<4x128xf32>
    %336 = arith.addf %331, %335 : vector<4x128xf32>
    %cst_124 = arith.constant 0.797884583 : f32
    %337 = vector.broadcast %cst_124 : f32 to vector<4x128xf32>
    %338 = arith.mulf %337, %336 : vector<4x128xf32>
    %339 = math.tanh %338 : vector<4x128xf32>
    %cst_125 = arith.constant 1.000000e+00 : f32
    %340 = vector.broadcast %cst_125 : f32 to vector<4x128xf32>
    %341 = arith.addf %340, %339 : vector<4x128xf32>
    %cst_126 = arith.constant 5.000000e-01 : f32
    %342 = vector.broadcast %cst_126 : f32 to vector<4x128xf32>
    %343 = arith.mulf %342, %341 : vector<4x128xf32>
    %344 = arith.mulf %331, %343 : vector<4x128xf32>
    %c1_127 = arith.constant 1 : index
    %c96_128 = arith.constant 96 : index
    %c0_129 = arith.constant 0 : index
    %345 = vector.load %arg2[%c1_127, %c96_128, %c0_129] : memref<2x224x128xf32, #tpu.memory_space<vmem>>, vector<1x128x32xf32>
    %346 = vector.shape_cast %345 : vector<1x128x32xf32> to vector<128x32xf32>
    %cst_130 = arith.constant dense<0.000000e+00> : vector<4x32xf32>
    %347 = tpu.matmul %344, %346, %cst_130 {dimension_numbers = #tpu.dot_dimension_numbers<[1], [0], [0], [1], [0, 0, 1, 1], [], []>} : vector<4x128xf32>, vector<128x32xf32>, vector<4x32xf32> -> vector<4x32xf32>
    %348 = arith.addf %303, %347 : vector<4x32xf32>
    %c23 = arith.constant 23 : index
    %c0_131 = arith.constant 0 : index
    %349 = vector.load %arg4[%c23, %c0_131] : memref<24x128xf32, #tpu.memory_space<vmem>>, vector<1x32xf32>
    %350 = vector.broadcast %349 : vector<1x32xf32> to vector<4x32xf32>
    %351 = arith.addf %348, %350 : vector<4x32xf32>
    %c1_132 = arith.constant 1 : index
    %c0_133 = arith.constant 0 : index
    %352 = vector.load %arg4[%c1_132, %c0_133] : memref<24x128xf32, #tpu.memory_space<vmem>>, vector<1x32xf32>
    %c2 = arith.constant 2 : index
    %c0_134 = arith.constant 0 : index
    %353 = vector.load %arg4[%c2, %c0_134] : memref<24x128xf32, #tpu.memory_space<vmem>>, vector<1x32xf32>
    %cst_135 = arith.constant dense<0.000000e+00> : vector<4xf32>
    %354 = vector.multi_reduction <add>, %351, %cst_135 [1] : vector<4x32xf32> to vector<4xf32>
    %355 = vector.shape_cast %354 : vector<4xf32> to vector<4x1xf32>
    %cst_136 = arith.constant 3.200000e+01 : f32
    %356 = vector.broadcast %cst_136 : f32 to vector<4x1xf32>
    %357 = arith.divf %355, %356 : vector<4x1xf32>
    %358 = vector.broadcast %357 : vector<4x1xf32> to vector<4x32xf32>
    %359 = arith.subf %351, %358 : vector<4x32xf32>
    %360 = arith.mulf %359, %359 : vector<4x32xf32>
    %cst_137 = arith.constant dense<0.000000e+00> : vector<4xf32>
    %361 = vector.multi_reduction <add>, %360, %cst_137 [1] : vector<4x32xf32> to vector<4xf32>
    %362 = vector.shape_cast %361 : vector<4xf32> to vector<4x1xf32>
    %cst_138 = arith.constant 3.200000e+01 : f32
    %363 = vector.broadcast %cst_138 : f32 to vector<4x1xf32>
    %364 = arith.divf %362, %363 : vector<4x1xf32>
    %cst_139 = arith.constant 9.99999997E-7 : f32
    %365 = vector.broadcast %cst_139 : f32 to vector<4x1xf32>
    %366 = arith.addf %364, %365 : vector<4x1xf32>
    %367 = math.rsqrt %366 : vector<4x1xf32>
    %368 = vector.broadcast %367 : vector<4x1xf32> to vector<4x32xf32>
    %369 = arith.mulf %359, %368 : vector<4x32xf32>
    %370 = vector.broadcast %352 : vector<1x32xf32> to vector<4x32xf32>
    %371 = arith.mulf %369, %370 : vector<4x32xf32>
    %372 = vector.broadcast %353 : vector<1x32xf32> to vector<4x32xf32>
    %373 = arith.addf %371, %372 : vector<4x32xf32>
    %c192 = arith.constant 192 : index
    %c0_140 = arith.constant 0 : index
    %374 = vector.load %arg3[%c192, %c0_140] : memref<288x128xf32, #tpu.memory_space<vmem>>, vector<32x32xf32>
    %cst_141 = arith.constant dense<0.000000e+00> : vector<4x32xf32>
    %375 = tpu.matmul %373, %374, %cst_141 {dimension_numbers = #tpu.dot_dimension_numbers<[1], [0], [0], [1], [0, 0, 1, 1], [], []>} : vector<4x32xf32>, vector<32x32xf32>, vector<4x32xf32> -> vector<4x32xf32>
    %c3 = arith.constant 3 : index
    %c0_142 = arith.constant 0 : index
    %376 = vector.load %arg4[%c3, %c0_142] : memref<24x128xf32, #tpu.memory_space<vmem>>, vector<1x32xf32>
    %377 = vector.broadcast %376 : vector<1x32xf32> to vector<4x32xf32>
    %378 = arith.addf %375, %377 : vector<4x32xf32>
    %c224 = arith.constant 224 : index
    %c0_143 = arith.constant 0 : index
    %379 = vector.load %arg3[%c224, %c0_143] : memref<288x128xf32, #tpu.memory_space<vmem>>, vector<64x32xf32>
    %380 = arith.mulf %378, %378 : vector<4x32xf32>
    %cst_144 = arith.constant dense<0.000000e+00> : vector<4xf32>
    %381 = vector.multi_reduction <add>, %380, %cst_144 [1] : vector<4x32xf32> to vector<4xf32>
    %382 = vector.shape_cast %381 : vector<4xf32> to vector<4x1xf32>
    %cst_145 = arith.constant 9.99999996E-13 : f32
    %383 = vector.broadcast %cst_145 : f32 to vector<4x1xf32>
    %384 = arith.addf %382, %383 : vector<4x1xf32>
    %385 = math.rsqrt %384 : vector<4x1xf32>
    %386 = vector.broadcast %385 : vector<4x1xf32> to vector<4x32xf32>
    %387 = arith.mulf %378, %386 : vector<4x32xf32>
    %cst_146 = arith.constant dense<0.000000e+00> : vector<4x64xf32>
    %388 = tpu.matmul %387, %379, %cst_146 {dimension_numbers = #tpu.dot_dimension_numbers<[1], [1], [0], [0], [0, 0, 1, 0], [], []>} : vector<4x32xf32>, vector<64x32xf32>, vector<4x64xf32> -> vector<4x64xf32>
    %389 = tpu.iota {dimensions = array<i32: 1>} : vector<4x64xi32>
    %cst_147 = arith.constant dense<0xFF800000> : vector<4xf32>
    %390 = vector.multi_reduction <maximumf>, %388, %cst_147 [1] : vector<4x64xf32> to vector<4xf32>
    %391 = vector.shape_cast %390 : vector<4xf32> to vector<4x1xf32>
    %392 = vector.broadcast %391 : vector<4x1xf32> to vector<4x64xf32>
    %393 = arith.cmpf oge, %388, %392 : vector<4x64xf32>
    %c64_i32 = arith.constant 64 : i32
    %394 = vector.broadcast %c64_i32 : i32 to vector<4x64xi32>
    %395 = arith.select %393, %389, %394 : vector<4x64xi1>, vector<4x64xi32>
    %cst_148 = arith.constant dense<2147483647> : vector<4xi32>
    %396 = vector.multi_reduction <minsi>, %395, %cst_148 [1] : vector<4x64xi32> to vector<4xi32>
    %397 = vector.shape_cast %396 : vector<4xi32> to vector<4x1xi32>
    %398 = vector.broadcast %397 : vector<4x1xi32> to vector<4x64xi32>
    %399 = arith.cmpi eq, %389, %398 : vector<4x64xi32>
    %400 = arith.extui %399 : vector<4x64xi1> to vector<4x64xi32>
    %401 = arith.sitofp %400 : vector<4x64xi32> to vector<4x64xf32>
    %cst_149 = arith.constant dense<0.000000e+00> : vector<4x32xf32>
    %402 = tpu.matmul %401, %379, %cst_149 {dimension_numbers = #tpu.dot_dimension_numbers<[1], [0], [0], [1], [0, 0, 1, 1], [], []>} : vector<4x64xf32>, vector<64x32xf32>, vector<4x32xf32> -> vector<4x32xf32>
    %c0_150 = arith.constant 0 : index
    %c0_151 = arith.constant 0 : index
    %c0_152 = arith.constant 0 : index
    %403 = vector.load %arg5[%c0_150, %c0_151, %c0_152] : memref<1x4x32xf32, #tpu.memory_space<vmem>>, vector<1x4x32xf32>
    %404 = vector.shape_cast %403 : vector<1x4x32xf32> to vector<4x32xf32>
    %405 = vector.shape_cast %402 : vector<4x32xf32> to vector<1x4x32xf32>
    tpu.vector_store %arg5[%c0_150, %c0_151, %c0_152], %405 {strides = array<i32>} : memref<1x4x32xf32, #tpu.memory_space<vmem>>, vector<1x4x32xf32>,
    %406 = arith.subf %402, %378 : vector<4x32xf32>
    %407 = arith.mulf %406, %406 : vector<4x32xf32>
    %cst_153 = arith.constant dense<0.000000e+00> : vector<4xf32>
    %408 = vector.multi_reduction <add>, %407, %cst_153 [1] : vector<4x32xf32> to vector<4xf32>
    %409 = vector.shape_cast %408 : vector<4xf32> to vector<4x1xf32>
    %cst_154 = arith.constant dense<0.000000e+00> : vector<1xf32>
    %410 = vector.multi_reduction <add>, %409, %cst_154 [0] : vector<4x1xf32> to vector<1xf32>
    %411 = vector.shape_cast %410 : vector<1xf32> to vector<1x1xf32>
    %c0_155 = arith.constant 0 : index
    %c0_156 = arith.constant 0 : index
    %c0_157 = arith.constant 0 : index
    %412 = vector.load %arg6[%c0_155, %c0_156, %c0_157] : memref<1x1x1xf32, #tpu.memory_space<vmem>>, vector<1x1x1xf32>
    %413 = vector.shape_cast %412 : vector<1x1x1xf32> to vector<1x1xf32>
    %414 = vector.shape_cast %411 : vector<1x1xf32> to vector<1x1x1xf32>
    tpu.vector_store %arg6[%c0_155, %c0_156, %c0_157], %414 {strides = array<i32>} : memref<1x1x1xf32, #tpu.memory_space<vmem>>, vector<1x1x1xf32>,
    return
  }
  func.func @transform_0(%arg0: i32) -> (i32, i32, i32) {
    %c0_i32 = arith.constant 0 : i32
    %c0_i32_0 = arith.constant 0 : i32
    %c0_i32_1 = arith.constant 0 : i32
    return %arg0, %c0_i32, %c0_i32_0 : i32, i32, i32
  }
  func.func @transform_1(%arg0: i32) -> (i32, i32, i32) {
    %c0_i32 = arith.constant 0 : i32
    %c0_i32_0 = arith.constant 0 : i32
    %c0_i32_1 = arith.constant 0 : i32
    %c0_i32_2 = arith.constant 0 : i32
    return %c0_i32, %c0_i32_0, %c0_i32_1 : i32, i32, i32
  }
  func.func @transform_2(%arg0: i32) -> (i32, i32) {
    %c0_i32 = arith.constant 0 : i32
    %c0_i32_0 = arith.constant 0 : i32
    %c0_i32_1 = arith.constant 0 : i32
    return %c0_i32, %c0_i32_0 : i32, i32
  }
  func.func @transform_3(%arg0: i32) -> (i32, i32) {
    %c0_i32 = arith.constant 0 : i32
    %c0_i32_0 = arith.constant 0 : i32
    %c0_i32_1 = arith.constant 0 : i32
    return %c0_i32, %c0_i32_0 : i32, i32
  }
  func.func @transform_4(%arg0: i32) -> (i32, i32, i32) {
    %c0_i32 = arith.constant 0 : i32
    %c0_i32_0 = arith.constant 0 : i32
    %c0_i32_1 = arith.constant 0 : i32
    return %arg0, %c0_i32, %c0_i32_0 : i32, i32, i32
  }
  func.func @transform_5(%arg0: i32) -> (i32, i32, i32) {
    %c0_i32 = arith.constant 0 : i32
    %c0_i32_0 = arith.constant 0 : i32
    %c0_i32_1 = arith.constant 0 : i32
    return %arg0, %c0_i32, %c0_i32_0 : i32, i32, i32
  }
}

</mosaic_0001>

<bundles_post_ra>
// kernel: vq_forward.1
= control target key start
LH: loop header
LB: loop body
LE: loop exit
PB: predicated region body
PF: predicated region fallthrough
CT: control target
= control target key end

     0   :  { %11 = vsyncpa [#allocation3], 0  ;;  %s4539_s0 = inlined_call_operand.vmem [shape: f32[2,4,192], index: 0, kind: input, shape index: {}]   ;;  %s4540_s1 = inlined_call_operand.vmem [shape: f32[2,224,128], index: 1, kind: input, shape index: {}]   ;;  %s4541_s2 = inlined_call_operand.vmem [shape: f32[288,128], index: 2, kind: input, shape index: {}]   ;;  %s4542_s3 = inlined_call_operand.vmem [shape: f32[24,128], index: 3, kind: input, shape index: {}]   ;;  %s4543_s4 = inlined_call_operand.hbm [shape: f32[2,4,32], index: 4, kind: output, shape index: {0}]   ;;  %s4544_s5 = inlined_call_operand.vmem [shape: f32[2,1,1], index: 5, kind: output, shape index: {1}]  }
   0x1   :  { %13 = vsyncpa [#allocation3 + $0x1], 0  ;;  %s3800_s18 = smov 0   ;;  %s3802_s19 = smov 0  }
   0x2   :  { %s3804_s20 = smov 0   ;;  %s3806_s21 = smov 0  }
   0x3 LB: > { %s3821_s22 = sadd.s32 4294967295, %s3756_s21   ;;  %s2934_s23 = sadd.s32 4294967294, %s3756_s21   ;;  %s3756_s21 = sphi %s3806_s21, %s4564_s21   ;;  %s3752_s20 = sphi %s3804_s20, %s4563_s20   ;;  %s3748_s19 = sphi %s3802_s19, %s4562_s19   ;;  %s3744_s18 = sphi %s3800_s18, %s4561_s18  }
   0x4   : > { %s3825_s24 = sadd.s32 1, %s3756_s21   ;;  %s115_s25 = sadd.s32 1, %s3752_s20 }
   0x5   : > { %s112_s26 = ssub.s32 %s3756_s21, %s3825_s24  ;;  %p125_p0 = scmp.ne.s32.totalorder %s3752_s20, %s3748_s19 }
   0x6   : > { %p113_p1 = scmp.eq.s32.totalorder %s112_s26, 0  ;;  %p126_p2 = scmp.eq.s32.totalorder %s3821_s22, 1 }
   0x7   : > { %p131_p3 = scmp.ne.s32.totalorder %s3748_s19, %s3744_s18  ;;  %p132_p4 = scmp.eq.s32.totalorder %s2934_s23, 1 }
   0x8   : > { %s3836_s27 = scalar_select %p113_p1, %s3752_s20, %s115_s25  }
   0x9   : > { %p3838_p5 = por %p126_p2, %p125_p0  ;;  %p3842_p6 = por %p132_p4, %p131_p3 }
   0xa   : > { %p2937_p7 = scmp.ge.s32.totalorder %s3756_s21, 1  ;;  %p193_p8 = scmp.lt.s32.totalorder %s3756_s21, 3 }
   0xc   : > { %p194_p9 = pnand %p2937_p7, %p193_p8 }
   0xd   : > { %v232_v0 = vld [vmem:[%s4541_s2] sm:$0xff] (!%p194_p9)  ;;  %v233_v1 = vld [vmem:[%s4541_s2 + $0x8] sm:$0xff] (!%p194_p9)  ;;  %v234_v2 = vld [vmem:[%s4541_s2 + $0x10] sm:$0xff] (!%p194_p9)  ;;  %p224_p10 = scmp.lt.s32.totalorder (!%p194_p9), %s3821_s22, 1  ;;  %v3758_v3 = vmov (!%p194_p9), 0.0|0.0   ;;  %vm264_vm0 = vcmask (!%p194_p9), 523264  }
   0xe   : > { %197 = sbr.rel (%p194_p9) target bundleno = 8363 (0x20ab), region = 36  ;;  %3429 = vmatprep.subr.bf16.mxu0 (!%p194_p9), %v3758_v3  ;;  %v3430_v4 = vpack.c.bf16 (!%p194_p9), %v233_v1, %v232_v0  ;;  %v235_v5 = vld [vmem:[%s4541_s2 + $0x18] sm:$0xff] (!%p194_p9)  ;;  %3465 = vmatprep.subr.bf16.mxu1 (!%p194_p9), %v3758_v3  ;;  %v236_v7 = vld [vmem:[%s4541_s2 + $0x20] sm:$0xff] (!%p194_p9)  ;;  %v237_v8 = vld [vmem:[%s4541_s2 + $0x28] sm:$0xff] (!%p194_p9)  ;;  %vm355_vm1 = vcmask (!%p194_p9), 257024   ;;  %vm3759_vm2 = vmmov (!%p194_p9), 0  }
   0xf   : > { %v3433_v6 = vpack.c.bf16 (!%p194_p9), %v235_v5, %v234_v2  ;;  %v3436_v9 = vpack.c.bf16 (!%p194_p9), %v237_v8, %v236_v7  ;;  %v238_v10 = vld [vmem:[%s4541_s2 + $0x30] sm:$0xff] (!%p194_p9)  ;;  %v239_v11 = vld [vmem:[%s4541_s2 + $0x38] sm:$0xff] (!%p194_p9)  ;;  %v240_v15 = vld [vmem:[%s4541_s2 + $0x40] sm:$0xff] (!%p194_p9)  ;;  %v3760_v56 = vmov (!%p194_p9), 0.0   ;;  %vm389_vm3 = vcmask (!%p194_p9), 261120   ;;  %s3761_s16 = smov (!%p194_p9), 120  }
  0x10   : > { %3431 = vmatpush1.bf16.msra.mxu0 (!%p194_p9), %v3430_v4  ;;  %v3439_v14 = vpack.c.bf16 (!%p194_p9), %v239_v11, %v238_v10  ;;  %v241_v16 = vld [vmem:[%s4541_s2 + $0x48] sm:$0xff] (!%p194_p9)  ;;  %v242_v18 = vld [vmem:[%s4541_s2 + $0x50] sm:$0xff] (!%p194_p9)  ;;  %v243_v19 = vld [vmem:[%s4541_s2 + $0x58] sm:$0xff] (!%p194_p9)  ;;  %3172 = vmatprep.mubr.msk.f32.mxu1 (!%p194_p9), %vm3759_vm2, %v3760_v56  ;;  %s3762_s17 = smov (!%p194_p9), 96   ;;  %vm466_vm4 = vcmask (!%p194_p9), 64512   ;;  %vm542_vm5 = vcmask (!%p194_p9), 27648  }
  0x11   : > { %3432 = vmatprep.subr.bf16.mxu0 (!%p194_p9), %v3758_v3  ;;  %v3442_v17 = vpack.c.bf16 (!%p194_p9), %v241_v16, %v240_v15  ;;  %v3445_v20 = vpack.c.bf16 (!%p194_p9), %v243_v19, %v242_v18  ;;  %v244_v21 = vld [vmem:[%s4541_s2 + $0x60] sm:$0xff] (!%p194_p9)  ;;  %v245_v22 = vld [vmem:[%s4541_s2 + $0x68] sm:$0xff] (!%p194_p9)  ;;  %v246_v24 = vld [vmem:[%s4541_s2 + $0x70] sm:$0xff] (!%p194_p9)  ;;  %s4546_s25 = smov (!%p194_p9), 80   ;;  %s3765_s26 = smov (!%p194_p9), 64   ;;  %vm653_vm9 = vcmask (!%p194_p9), 1043456  }
  0x12   : > { %v3448_v23 = vpack.c.bf16 (!%p194_p9), %v245_v22, %v244_v21  ;;  %v247_v25 = vld [vmem:[%s4541_s2 + $0x78] sm:$0xff] (!%p194_p9)  ;;  %v248_v27 = vld [vmem:[%s4541_s2 + $0x80] sm:$0xff] (!%p194_p9)  ;;  %v249_v28 = vld [vmem:[%s4541_s2 + $0x88] sm:$0xff] (!%p194_p9)  ;;  %vm649_vm10 = vcmask (!%p194_p9), 31744   ;;  %s4547_s6 = smov (!%p194_p9), 72   ;;  %s4545_s7 = smov (!%p194_p9), 104  }
  0x13   : > { %v3451_v26 = vpack.c.bf16 (!%p194_p9), %v247_v25, %v246_v24  ;;  %v3454_v29 = vpack.c.bf16 (!%p194_p9), %v249_v28, %v248_v27  ;;  %v250_v30 = vld [vmem:[%s4541_s2 + $0x90] sm:$0xff] (!%p194_p9)  ;;  %v251_v31 = vld [vmem:[%s4541_s2 + $0x98] sm:$0xff] (!%p194_p9)  ;;  %v252_v33 = vld [vmem:[%s4541_s2 + $0xa0] sm:$0xff] (!%p194_p9)  ;;  %s3769_s14 = smov (!%p194_p9), [#allocation2]  }
  0x14   : > { %3434 = vmatpush1.bf16.msra.mxu0 (!%p194_p9), %v3433_v6  ;;  %v3457_v32 = vpack.c.bf16 (!%p194_p9), %v251_v31, %v250_v30  ;;  %v253_v34 = vld [vmem:[%s4541_s2 + $0xa8] sm:$0xff] (!%p194_p9)  ;;  %v254_v36 = vld [vmem:[%s4541_s2 + $0xb0] sm:$0xff] (!%p194_p9)  ;;  %v255_v37 = vld [vmem:[%s4541_s2 + $0xb8] sm:$0xff] (!%p194_p9)  ;;  %s3698_s15 = sshll.u32 (!%p194_p9), %s3769_s14, 4  ;;  %s3699_s15 = int_to_ptr.vmem [resolvable:$false] %s3698_s15 }
  0x15   : > { %s3864_s13 = scalar_select %p224_p10, %s3821_s22, 1  ;;  %3435 = vmatprep.subr.bf16.mxu0 %v3758_v3  ;;  %v3460_v35 = vpack.c.bf16 %v253_v34, %v252_v33  ;;  %v3463_v38 = vpack.c.bf16 %v255_v37, %v254_v36  ;;  %v2941_v39 = vld [vmem:[%s4542_s3] ss:$0 sm:$0xff]  ;;  %v337_v41 = vld [vmem:[%s4542_s3 + $0x4] sm:$0xf]  ;;  %v381_v52 = vld [vmem:[%s4540_s1 + $0x8] sm:$0xff] }
  0x16   : > { %v380_v51 = vld [vmem:[%s4540_s1] sm:$0xff]  ;;  %v382_v53 = vld [vmem:[%s4540_s1 + $0x10] sm:$0xff]  ;;  %v383_v55 = vld [vmem:[%s4540_s1 + $0x18] sm:$0xff] }
  0x17   : > { %s3044_s23 = sshll.u32 %s3864_s13, 3  ;;  %v3466_v54 = vpack.c.bf16 %v381_v52, %v380_v51  ;;  %v3469_v57 = vpack.c.bf16 %v383_v55, %v382_v53  ;;  %v2943_v62 = vld [vmem:[%s4542_s3 + $0x8] ss:$0 sm:$0xff]  ;;  %v2944_v0 = vld [vmem:[%s4542_s3 + $0x9] ss:$0 sm:$0xff] }
  0x18   : > { %s228_s30 = scalar_lea.vmem %s4539_s0, %s3044_s23  ;;  %3437 = vmatpush1.bf16.msra.mxu0 %v3436_v9  ;;  %v2945_v4 = vld [vmem:[%s4542_s3 + $0xa] ss:$0 sm:$0xff]  ;;  %s3763_s23 = smov 88  }
  0x19   : > { %v256_v12 = vld [vmem:[%s228_s30] sm:$0xff]  ;;  %3438 = vmatprep.subr.bf16.mxu0 %v3758_v3  ;;  %3467 = vmatpush3.bf16.msra.mxu1 %v3466_v54  ;;  %s3766_s30 = smov 112  }
  0x1a   : > { %v263_v13 = vcombine.high %v256_v12, %v256_v12  ;;  %3468 = vmatprep.subr.bf16.mxu1 %v3758_v3 }
  0x1c   : > { %2942 = vmatprep.mubr.msk.f32.mxu0 %vm264_vm0, %v263_v13  ;;  %3440 = vmatpush1.bf16.msra.mxu0 %v3439_v14 }
  0x1d   : > { %3441 = vmatprep.subr.bf16.mxu0 %v3758_v3  ;;  %3470 = vmatpush3.bf16.msra.mxu1 %v3469_v57 }
  0x1e   : > { %3175 = vmatprep.subr.mxu1 %v3760_v56 }
  0x20   : > { %3443 = vmatpush1.bf16.msra.mxu0 %v3442_v17 }
  0x21   : > { %3444 = vmatprep.subr.bf16.mxu0 %v3758_v3 }
  0x24   : > { %3446 = vmatpush1.bf16.msra.mxu0 %v3445_v20 }
  0x25   : > { %3447 = vmatprep.subr.bf16.mxu0 %v3758_v3 }
  0x28   : > { %3449 = vmatpush1.bf16.msra.mxu0 %v3448_v23 }
  0x29   : > { %3450 = vmatprep.subr.bf16.mxu0 %v3758_v3 }
  0x2c   : > { %3452 = vmatpush1.bf16.msra.mxu0 %v3451_v26 }
  0x2d   : > { %3453 = vmatprep.subr.bf16.mxu0 %v3758_v3 }
  0x30   : > { %3455 = vmatpush1.bf16.msra.mxu0 %v3454_v29  ;;  %v339_v29 = vlaneseq }
  0x31   : > { %3456 = vmatprep.subr.bf16.mxu0 %v3758_v3 }
  0x32   : > { %v4014_v30 = vand.u32 127, %v339_v29 }
  0x34   : > { %3458 = vmatpush1.bf16.msra.mxu0 %v3457_v32  ;;  %vm344_vm6 = vcmp.ge.s32.totalorder %v4014_v30, 8  ;;  %vm345_vm7 = vcmp.lt.s32.totalorder %v4014_v30, 16  ;;  %vm342_vm11 = vcmp.lt.s32.totalorder %v4014_v30, 8  ;;  %vm347_vm12 = vcmp.ge.s32.totalorder %v4014_v30, 16 }
  0x35   : > { %3459 = vmatprep.subr.bf16.mxu0 %v3758_v3  ;;  %vm4018_vm8 = vmand %vm344_vm6, %vm345_vm7  ;;  %vm348_vm13 = vcmp.lt.s32.totalorder %v4014_v30, 24  ;;  %vm350_vm15 = vcmp.ge.s32.totalorder %v4014_v30, 24  ;;  %vm351_vm6 = vcmp.lt.s32.totalorder %v4014_v30, 32 }
  0x36   : > { %vm4040_vm14 = vmand %vm347_vm12, %vm348_vm13 }
  0x37   : > { %vm4064_vm7 = vmand %vm350_vm15, %vm351_vm6 }
  0x38   : > { %3461 = vmatpush1.bf16.msra.mxu0 %v3460_v35 }
  0x39   : > { %3462 = vmatprep.subr.bf16.mxu0 %v3758_v3 }
  0x3c   : > { %3464 = vmatpush1.bf16.msra.mxu0 %v3463_v38 }
  0x3d   : > { %3477 = vmatprep.subr.bf16.mxu0 %v3758_v3 }
  0x3f   : > { %332 = vmatmul.mubr.f32.vlgmr.msra.gmra.mrb[0].mxu0 %v256_v12 }
  0x40   : > { %3234 = vmatprep.mubr.msk.f32.mxu0 %vm3759_vm2, %v3760_v56 }
 0x112   : > { %v333_v40 = vpop.f32.mrb[0].mxu0 }
 0x113   : > { %v334_v42 = vadd.f32 %v2941_v39, %v333_v40  ;;  %v335_v43 = vpop.f32.mrb[1].mxu0 }
 0x115   : > { %v3949_v44 = vadd.f32 %v337_v41, %v334_v42 }
 0x117   : > { %v356_v45 = vsel %vm355_vm1, %v3949_v44, 0.0 }
 0x118   : > { %357 = vadd.xlane.f32.xlu0 %v356_v45 }
 0x1a5   : > { %v358_v46 = vpop.xlane.xlu0 %357 }
 0x1a6   : > { %v360_v47 = vmul.f32 0.03125, %v358_v46 }
 0x1a8   : > { %v361_v48 = vsub.f32 %v3949_v44, %v360_v47 }
 0x1aa   : > { %v362_v49 = vmul.f32 %v361_v48, %v361_v48 }
 0x1ac   : > { %v363_v50 = vsel %vm355_vm1, %v362_v49, 0.0 }
 0x1ad   : > { %364 = vadd.xlane.f32.xlu0 %v363_v50 }
 0x23a   : > { %v365_v58 = vpop.xlane.xlu0 %364 }
 0x23b   : > { %v366_v59 = vmul.f32 0.03125, %v365_v58 }
 0x23d   : > { %v367_v60 = vadd.f32 1e-06, %v366_v59 }
 0x23f   : > { %3646 = vrsqrt.f32 %v367_v60 }
 0x249   : > { %v3647_v61 = vpop.eup %3646 }
 0x24a   : > { %v369_v63 = vmul.f32 %v3647_v61, %v361_v48 }
 0x24c   : > { %v374_v1 = vmul.f32 %v2943_v62, %v369_v63 }
 0x24e   : > { %v379_v2 = vadd.f32 %v2944_v0, %v374_v1 }
 0x250   : > { %3173 = vmatmul.mubr.msk.f32.vlgmr.msra.gmra.mrb[0].mxu1 %vm389_vm3, %v379_v2 }
 0x251   : > { %3177 = vmatprep.mubr.msk.f32.mxu1 %vm3759_vm2, %v3760_v56 }
 0x323   : > { %v459_v5 = vpop.f32.mrb[0].mxu1 }
 0x324   : > { %v3985_v6 = vadd.f32 %v2945_v4, %v459_v5  ;;  %v3174_v7 = vpop.f32.mrb[1].mxu1 }
 0x326   : > { %558 = vrot.lane.b32.xlu0 %v3985_v6, %s3761_s16  ;;  %464 = vrot.lane.b32.xlu1 %v3985_v6, %s3762_s17 }
 0x32a   : > { %560 = vrot.lane.b32.xlu1 %v3985_v6, %s3763_s23 }
 0x398   : > { %v465_v8 = vpop.permute.xlu1 %464  ;;  %v559_v10 = vpop.permute.xlu0 %558 }
 0x399   : > { %3176 = vmatpush3.xpose.msk.msra.mxu1 %vm466_vm4, %v465_v8 }
 0x39a   : > { %3180 = vmatprep.subr.mxu1 %v3760_v56 }
 0x39c   : > { %3178 = vmatmul.mubr.msk.f32.vlgmr.msra.gmra.mrb[2].mxu1 %vm466_vm4, %v3985_v6  ;;  %v561_v9 = vpop.permute.xlu1 %560 }
 0x39d   : > { %3181 = vmatpush3.xpose.msk.msra.mxu1 %vm466_vm4, %v561_v9  ;;  %3182 = vmatprep.mubr.msk.f32.mxu1 %vm3759_vm2, %v3760_v56 }
 0x39e   : > { %3185 = vmatprep.subr.mxu1 %v3760_v56 }
 0x3a0   : > { %3183 = vmatmul.mubr.msk.f32.vlgmr.msra.gmra.mrb[4].mxu1 %vm466_vm4, %v559_v10  ;;  %v1139_v10 = vld [vmem:[%s4540_s1 + $0x20] sm:$0xff] }
 0x3a1   : > { %3187 = vmatprep.mubr.msk.f32.mxu1 %vm3759_vm2, %v3760_v56 }
 0x46f   : > { %v537_v11 = vpop.f32.mrb[2].mxu1 }
 0x470   : > { %v541_v12 = vmul.f32 0.35355338, %v537_v11  ;;  %v3179_v13 = vpop.f32.mrb[3].mxu1  ;;  %v1140_v11 = vld [vmem:[%s4540_s1 + $0x28] sm:$0xff] }
 0x471   : > { %v3472_v13 = vpack.c.bf16 %v1140_v11, %v1139_v10  ;;  %v1354_v10 = vld [vmem:[%s4540_s1 + $0xd8] sm:$0xff] }
 0x472   : > { %v543_v14 = vsel %vm542_vm5, %v541_v12, -inf }
 0x473   : > { %544 = vmax.xlane.f32.xlu0 %v543_v14  ;;  %v632_v15 = vpop.f32.mrb[4].mxu1 }
 0x474   : > { %v636_v16 = vmul.f32 0.35355338, %v632_v15  ;;  %v3184_v17 = vpop.f32.mrb[5].mxu1  ;;  %v1141_v15 = vld [vmem:[%s4540_s1 + $0x30] sm:$0xff] }
 0x476   : > { %v637_v18 = vsel %vm542_vm5, %v636_v16, -inf }
 0x477   : > { %638 = vmax.xlane.f32.xlu1 %v637_v18 }
 0x489   : > { %805 = vrot.lane.b32.xlu0 %v3985_v6, %s4546_s25  ;;  %s3700_s25 = scalar_lea.vmem %s3699_s15, 128 }
 0x500   : > { %v545_v19 = vpop.xlane.xlu0 %544 }
 0x501   : > { %v546_v20 = vsub.f32 %v541_v12, %v545_v19 }
 0x503   : > { %v547_v21 = vmul.f32 1.442695, %v546_v20 }
 0x504   : > { %v639_v22 = vpop.xlane.xlu1 %638  ;;  %v806_v41 = vpop.permute.xlu0 %805 }
 0x505   : > { %3648 = vpow2.f32 %v547_v21  ;;  %v640_v23 = vsub.f32 %v636_v16, %v639_v22  ;;  %v1142_v16 = vld [vmem:[%s4540_s1 + $0x38] sm:$0xff]  ;;  %v2964_v21 = vld [vmem:[%s4542_s3 + $0xb] ss:$0 sm:$0xff] }
 0x506   : > { %v3475_v17 = vpack.c.bf16 %v1142_v16, %v1141_v15 }
 0x507   : > { %v641_v24 = vmul.f32 1.442695, %v640_v23 }
 0x509   : > { %3650 = vpow2.f32 %v641_v24 }
 0x50f   : > { %v3649_v25 = vpop.eup %3648 }
 0x510   : > { %v549_v26 = vsel %vm542_vm5, %v3649_v25, 0.0 }
 0x511   : > { %550 = vadd.xlane.f32.xlu1 %v549_v26 }
 0x513   : > { %v3651_v27 = vpop.eup %3650 }
 0x514   : > { %v643_v28 = vsel %vm542_vm5, %v3651_v27, 0.0 }
 0x515   : > { %644 = vadd.xlane.f32.xlu1 %v643_v28 }
 0x526   : > { %554 = vrot.lane.b32.xlu1 %v3985_v6, %s3765_s26 }
 0x52a   : > { %803 = vrot.lane.b32.xlu1 %v3985_v6, %s3766_s30 }
 0x59e   : > { %v551_v31 = vpop.xlane.xlu1 %550 }
 0x5a2   : > { %v645_v32 = vpop.xlane.xlu1 %644 }
 0x5a3   : > { %3652 = vrcp.f32 %v645_v32  ;;  %v1248_v32 = vld [vmem:[%s4540_s1 + $0x40] sm:$0xff] }
 0x5a4   : > { %3654 = vrcp.f32 %v551_v31 }
 0x5a6   : > { %v555_v34 = vpop.permute.xlu1 %554 }
 0x5a7   : > { %v648_v35 = vsel %vm4018_vm8, %v555_v34, 0.0  ;;  %v557_v38 = vsel %vm342_vm11, %v555_v34, 0.0  ;;  %v893_v45 = vsel %vm4040_vm14, %v555_v34, 0.0  ;;  %v1061_v62 = vsel %vm4064_vm7, %v555_v34, 0.0 }
 0x5a8   : > { %3186 = vmatpush3.msk.msra.mxu1 %vm653_vm9, %v648_v35  ;;  %v1250_v35 = vld [vmem:[%s4540_s1 + $0x50] sm:$0xff] }
 0x5a9   : > { %3190 = vmatprep.subr.mxu1 %v3760_v56 }
 0x5aa   : > { %v804_v43 = vpop.permute.xlu1 %803 }
 0x5ad   : > { %v3653_v36 = vpop.eup %3652 }
 0x5ae   : > { %v647_v37 = vmul.f32 %v3653_v36, %v3651_v27  ;;  %v3655_v39 = vpop.eup %3654  ;;  %v1251_v36 = vld [vmem:[%s4540_s1 + $0x58] sm:$0xff] }
 0x5af   : > { %v553_v40 = vmul.f32 %v3655_v39, %v3649_v25  ;;  %v1340_v39 = vld [vmem:[%s4540_s1 + $0x68] sm:$0xff] }
 0x5b0   : > { %3188 = vmatmul.mubr.msk.f32.vlgmr.msra.gmra.mrb[6].mxu1 %vm649_vm10, %v647_v37  ;;  %v3481_v37 = vpack.c.bf16 %v1251_v36, %v1250_v35 }
 0x5b1   : > { %3191 = vmatpush3.msk.msra.mxu1 %vm653_vm9, %v557_v38  ;;  %3192 = vmatprep.mubr.msk.f32.mxu1 %vm3759_vm2, %v3760_v56  ;;  %v1339_v38 = vld [vmem:[%s4540_s1 + $0x60] sm:$0xff] }
 0x5b2   : > { %3195 = vmatprep.subr.mxu1 %v3760_v56 }
 0x5b8   : > { %3193 = vmatmul.mubr.msk.f32.vlgmr.msra.gmra.mrb[6].mxu1 %vm649_vm10, %v553_v40  ;;  %v3484_v40 = vpack.c.bf16 %v1340_v39, %v1339_v38  ;;  %v2972_v38 = vld [vmem:[%s4540_s1 + $0xe0] sm:$0xff] }
 0x5b9   : > { %3196 = vmatpush3.xpose.msk.msra.mxu1 %vm466_vm4, %v806_v41  ;;  %3197 = vmatprep.mubr.msk.f32.mxu1 %vm3759_vm2, %v3760_v56 }
 0x5ba   : > { %3200 = vmatprep.subr.mxu1 %v3760_v56 }
 0x5bc   : > { %3198 = vmatmul.mubr.msk.f32.vlgmr.msra.gmra.mrb[8].mxu1 %vm466_vm4, %v804_v43 }
 0x5bd   : > { %3201 = vmatpush3.msk.msra.mxu1 %vm653_vm9, %v893_v45  ;;  %3202 = vmatprep.mubr.msk.f32.mxu1 %vm3759_vm2, %v3760_v56 }
 0x5be   : > { %3205 = vmatprep.subr.mxu1 %v3760_v56 }
 0x68f   : > { %v877_v46 = vpop.f32.mrb[8].mxu1 }
 0x690   : > { %v881_v47 = vmul.f32 0.35355338, %v877_v46  ;;  %v3199_v48 = vpop.f32.mrb[9].mxu1 }
 0x692   : > { %v882_v49 = vsel %vm542_vm5, %v881_v47, -inf }
 0x693   : > { %883 = vmax.xlane.f32.xlu1 %v882_v49  ;;  %v2966_v49 = vld [vmem:[%s4542_s3 + $0xd] ss:$0 sm:$0xff] }
 0x6a4   : > { %973 = vrot.lane.b32.xlu1 %v3985_v6, %s4547_s6 }
 0x720   : > { %v884_v50 = vpop.xlane.xlu1 %883 }
 0x721   : > { %v885_v51 = vsub.f32 %v881_v47, %v884_v50  ;;  %v2965_v47 = vld [vmem:[%s4542_s3 + $0xc] ss:$0 sm:$0xff] }
 0x723   : > { %v886_v52 = vmul.f32 1.442695, %v885_v51 }
 0x724   : > { %v974_v59 = vpop.permute.xlu1 %973 }
 0x725   : > { %3656 = vpow2.f32 %v886_v52  ;;  %v1341_v52 = vld [vmem:[%s4540_s1 + $0x70] sm:$0xff] }
 0x72f   : > { %v3657_v53 = vpop.eup %3656 }
 0x730   : > { %v888_v54 = vsel %vm542_vm5, %v3657_v53, 0.0 }
 0x731   : > { %889 = vadd.xlane.f32.xlu0 %v888_v54 }
 0x747   : > { %971 = vrot.lane.b32.xlu0 %v3985_v6, %s4545_s7 }
 0x7be   : > { %v890_v55 = vpop.xlane.xlu0 %889 }
 0x7bf   : > { %3658 = vrcp.f32 %v890_v55  ;;  %v1343_v55 = vld [vmem:[%s4540_s1 + $0x80] sm:$0xff] }
 0x7c2   : > { %v972_v61 = vpop.permute.xlu0 %971 }
 0x7c9   : > { %v3659_v57 = vpop.eup %3658 }
 0x7ca   : > { %v892_v58 = vmul.f32 %v3659_v57, %v3657_v53  ;;  %v1342_v53 = vld [vmem:[%s4540_s1 + $0x78] sm:$0xff]  ;;  %v1344_v57 = vld [vmem:[%s4540_s1 + $0x88] sm:$0xff] }
 0x7cb   : > { %v3487_v54 = vpack.c.bf16 %v1342_v53, %v1341_v52 }
 0x7cc   : > { %3203 = vmatmul.mubr.msk.f32.vlgmr.msra.gmra.mrb[6].mxu1 %vm649_vm10, %v892_v58  ;;  %v3490_v58 = vpack.c.bf16 %v1344_v57, %v1343_v55 }
 0x7cd   : > { %3206 = vmatpush3.xpose.msk.msra.mxu1 %vm466_vm4, %v974_v59  ;;  %3207 = vmatprep.mubr.msk.f32.mxu1 %vm3759_vm2, %v3760_v56  ;;  %v1345_v59 = vld [vmem:[%s4540_s1 + $0x90] sm:$0xff] }
 0x7ce   : > { %3210 = vmatprep.subr.mxu1 %v3760_v56 }
 0x7d0   : > { %3208 = vmatmul.mubr.msk.f32.vlgmr.msra.gmra.mrb[10].mxu1 %vm466_vm4, %v972_v61  ;;  %v1346_v61 = vld [vmem:[%s4540_s1 + $0x98] sm:$0xff] }
 0x7d1   : > { %3211 = vmatpush3.msk.msra.mxu1 %vm653_vm9, %v1061_v62  ;;  %3212 = vmatprep.mubr.msk.f32.mxu1 %vm3759_vm2, %v3760_v56  ;;  %v3493_v62 = vpack.c.bf16 %v1346_v61, %v1345_v59 }
 0x7d2   : > { %3471 = vmatprep.subr.bf16.mxu1 %v3758_v3 }
 0x8a3   : > { %v1045_v63 = vpop.f32.mrb[10].mxu1 }
 0x8a4   : > { %v1049_v0 = vmul.f32 0.35355338, %v1045_v63  ;;  %v3209_v1 = vpop.f32.mrb[11].mxu1  ;;  %v1347_v63 = vld [vmem:[%s4540_s1 + $0xa0] sm:$0xff] }
 0x8a5   : > { %v1349_v1 = vld [vmem:[%s4540_s1 + $0xb0] sm:$0xff] }
 0x8a6   : > { %v1050_v2 = vsel %vm542_vm5, %v1049_v0, -inf }
 0x8a7   : > { %1051 = vmax.xlane.f32.xlu1 %v1050_v2 }
 0x934   : > { %v1052_v4 = vpop.xlane.xlu1 %1051 }
 0x935   : > { %v1053_v5 = vsub.f32 %v1049_v0, %v1052_v4  ;;  %v1348_v0 = vld [vmem:[%s4540_s1 + $0xa8] sm:$0xff]  ;;  %v1350_v4 = vld [vmem:[%s4540_s1 + $0xb8] sm:$0xff] }
 0x936   : > { %v3496_v2 = vpack.c.bf16 %v1348_v0, %v1347_v63 }
 0x937   : > { %v1054_v6 = vmul.f32 1.442695, %v1053_v5  ;;  %v3499_v5 = vpack.c.bf16 %v1350_v4, %v1349_v1 }
 0x939   : > { %3660 = vpow2.f32 %v1054_v6  ;;  %v1351_v6 = vld [vmem:[%s4540_s1 + $0xc0] sm:$0xff] }
 0x943   : > { %v3661_v7 = vpop.eup %3660 }
 0x944   : > { %v1056_v8 = vsel %vm542_vm5, %v3661_v7, 0.0 }
 0x945   : > { %1057 = vadd.xlane.f32.xlu0 %v1056_v8 }
 0x9d2   : > { %v1058_v9 = vpop.xlane.xlu0 %1057 }
 0x9d3   : > { %3662 = vrcp.f32 %v1058_v9  ;;  %v1353_v9 = vld [vmem:[%s4540_s1 + $0xd0] sm:$0xff] }
 0x9d4   : > { %v3505_v11 = vpack.c.bf16 %v1354_v10, %v1353_v9 }
 0x9dd   : > { %v3663_v12 = vpop.eup %3662 }
 0x9de   : > { %v1060_v14 = vmul.f32 %v3663_v12, %v3661_v7  ;;  %v1352_v7 = vld [vmem:[%s4540_s1 + $0xc8] sm:$0xff] }
 0x9df   : > { %v3502_v8 = vpack.c.bf16 %v1352_v7, %v1351_v6  ;;  %v2967_v12 = vld [vmem:[%s4542_s3 + $0xe] ss:$0 sm:$0xff] }
 0x9e0   : > { %3213 = vmatmul.mubr.msk.f32.vlgmr.msra.gmra.mrb[6].mxu1 %vm649_vm10, %v1060_v14 }
 0x9e1   : > { %3473 = vmatpush3.bf16.msra.mxu1 %v3472_v13  ;;  %3223 = vmatprep.mubr.msk.f32.mxu1 %vm3759_vm2, %v3760_v56 }
 0x9e2   : > { %3474 = vmatprep.subr.bf16.mxu1 %v3758_v3 }
 0x9e5   : > { %3476 = vmatpush3.bf16.msra.mxu1 %v3475_v17 }
 0x9e6   : > { %3483 = vmatprep.subr.bf16.mxu1 %v3758_v3 }
 0xab3   : > { %v1134_v18 = vpop.f32.mrb[6].mxu1 }
 0xab4   : > { %v3214_v19 = vpop.f32.mrb[7].mxu1  ;;  %3224 = vmatmul.mubr.msk.f32.vlgmr.msra.gmra.mrb[12].mxu1 %vm389_vm3, %v1134_v18 }
 0xab5   : > { %3269 = vmatprep.mubr.msk.f32.mxu1 %vm3759_vm2, %v3760_v56  ;;  %3485 = vmatpush3.bf16.msra.mxu1 %v3484_v40  ;;  %v2974_v40 = vld [vmem:[%s4540_s1 + $0xf0] sm:$0xff] }
 0xab6   : > { %3486 = vmatprep.subr.bf16.mxu1 %v3758_v3 }
 0xab9   : > { %3488 = vmatpush3.bf16.msra.mxu1 %v3487_v54  ;;  %v2976_v54 = vld [vmem:[%s4542_s3 + $0x12] ss:$0 sm:$0xff] }
 0xaba   : > { %3489 = vmatprep.subr.bf16.mxu1 %v3758_v3 }
 0xabd   : > { %3491 = vmatpush3.bf16.msra.mxu1 %v3490_v58 }
 0xabe   : > { %3492 = vmatprep.subr.bf16.mxu1 %v3758_v3 }
 0xac1   : > { %3494 = vmatpush3.bf16.msra.mxu1 %v3493_v62 }
 0xac2   : > { %3495 = vmatprep.subr.bf16.mxu1 %v3758_v3 }
 0xac5   : > { %3497 = vmatpush3.bf16.msra.mxu1 %v3496_v2 }
 0xac6   : > { %3498 = vmatprep.subr.bf16.mxu1 %v3758_v3 }
 0xac9   : > { %3500 = vmatpush3.bf16.msra.mxu1 %v3499_v5 }
 0xaca   : > { %3501 = vmatprep.subr.bf16.mxu1 %v3758_v3 }
 0xacd   : > { %3503 = vmatpush3.bf16.msra.mxu1 %v3502_v8 }
 0xace   : > { %3504 = vmatprep.subr.bf16.mxu1 %v3758_v3 }
 0xad1   : > { %3506 = vmatpush3.bf16.msra.mxu1 %v3505_v11 }
 0xad2   : > { %3313 = vmatprep.subr.mxu1 %v3760_v56 }
 0xb87   : > { %v1212_v20 = vpop.f32.mrb[12].mxu1 }
 0xb88   : > { %v1216_v22 = vadd.f32 %v1212_v20, %v3949_v44  ;;  %v3225_v23 = vpop.f32.mrb[13].mxu1  ;;  %v1249_v44 = vld [vmem:[%s4540_s1 + $0x48] sm:$0xff] }
 0xb89   : > { %v3478_v34 = vpack.c.bf16 %v1249_v44, %v1248_v32 }
 0xb8a   : > { %v4102_v24 = vadd.f32 %v2964_v21, %v1216_v22 }
 0xb8b   : > { %3479 = vmatpush3.bf16.msra.mxu0 %v3478_v34 }
 0xb8c   : > { %v1225_v25 = vsel %vm355_vm1, %v4102_v24, 0.0  ;;  %3480 = vmatprep.subr.bf16.mxu0 %v3758_v3 }
 0xb8d   : > { %1226 = vadd.xlane.f32.xlu1 %v1225_v25 }
 0xb8f   : > { %3482 = vmatpush3.bf16.msra.mxu0 %v3481_v37 }
 0xb90   : > { %3507 = vmatprep.subr.bf16.mxu0 %v3758_v3 }
 0xc1a   : > { %v1227_v26 = vpop.xlane.xlu1 %1226 }
 0xc1b   : > { %v1228_v27 = vmul.f32 0.03125, %v1227_v26 }
 0xc1d   : > { %v1229_v28 = vsub.f32 %v4102_v24, %v1228_v27  ;;  %v2969_v27 = vld [vmem:[%s4542_s3 + $0xf] ss:$0 sm:$0xff] }
 0xc1f   : > { %v1230_v29 = vmul.f32 %v1229_v28, %v1229_v28 }
 0xc21   : > { %v1231_v31 = vsel %vm355_vm1, %v1230_v29, 0.0 }
 0xc22   : > { %1232 = vadd.xlane.f32.xlu1 %v1231_v31 }
 0xcaf   : > { %v1233_v41 = vpop.xlane.xlu1 %1232 }
 0xcb0   : > { %v1234_v43 = vmul.f32 0.03125, %v1233_v41  ;;  %v2975_v41 = vld [vmem:[%s4540_s1 + $0xf8] sm:$0xff] }
 0xcb2   : > { %v1235_v45 = vadd.f32 1e-06, %v1234_v43  ;;  %v3511_v43 = vpack.c.bf16 %v2975_v41, %v2974_v40 }
 0xcb4   : > { %3664 = vrsqrt.f32 %v1235_v45 }
 0xcbe   : > { %v3665_v46 = vpop.eup %3664 }
 0xcbf   : > { %v1237_v48 = vmul.f32 %v3665_v46, %v1229_v28 }
 0xcc1   : > { %v1242_v50 = vmul.f32 %v2965_v47, %v1237_v48 }
 0xcc3   : > { %v1247_v51 = vadd.f32 %v2966_v49, %v1242_v50  ;;  %v2970_v49 = vld [vmem:[%s4542_s3 + $0x10] ss:$0 sm:$0xff] }
 0xcc5   : > { %3235 = vmatmul.mubr.msk.f32.vlgmr.msra.gmra.mrb[2].mxu0 %vm389_vm3, %v1247_v51  ;;  %v2971_v51 = vld [vmem:[%s4542_s3 + $0x11] ss:$0 sm:$0xff] }
 0xcc6   : > { %3280 = vmatprep.mubr.msk.f32.mxu0 %vm3759_vm2, %v3760_v56 }
 0xd98   : > { %v1326_v13 = vpop.f32.mrb[2].mxu0 }
 0xd99   : > { %v1327_v14 = vadd.f32 %v2967_v12, %v1326_v13  ;;  %v3236_v15 = vpop.f32.mrb[3].mxu0 }
 0xd9b   : > { %v1330_v16 = vmul.f32 %v1327_v14, %v1327_v14 }
 0xd9d   : > { %v1331_v17 = vmul.f32 %v1330_v16, %v1327_v14 }
 0xd9f   : > { %v1332_v18 = vmul.f32 0.044715, %v1331_v17 }
 0xda1   : > { %v1333_v19 = vadd.f32 %v1332_v18, %v1327_v14 }
 0xda3   : > { %v1334_v20 = vmul.f32 0.7978846, %v1333_v19 }
 0xda5   : > { %3666 = vtanh.f32 %v1334_v20 }
 0xdaf   : > { %v3667_v21 = vpop.eup %3666 }
 0xdb0   : > { %v1336_v22 = vadd.f32 1.0, %v3667_v21 }
 0xdb2   : > { %v1337_v23 = vmul.f32 0.5, %v1336_v22 }
 0xdb4   : > { %v1338_v25 = vmul.f32 %v1337_v23, %v1327_v14 }
 0xdb6   : > { %3270 = vmatmul.mubr.f32.vlgmr.msra.gmra.mrb[14].mxu1 %v1338_v25 }
 0xdb7   : > { %3315 = vmatprep.mubr.msk.f32.mxu1 %vm3759_vm2, %v3760_v56 }
 0xe89   : > { %v1421_v26 = vpop.f32.mrb[14].mxu1 }
 0xe8a   : > { %v1425_v28 = vadd.f32 %v1421_v26, %v4102_v24  ;;  %v3271_v29 = vpop.f32.mrb[15].mxu1  ;;  %v2973_v24 = vld [vmem:[%s4540_s1 + $0xe8] sm:$0xff] }
 0xe8b   : > { %v3508_v39 = vpack.c.bf16 %v2973_v24, %v2972_v38 }
 0xe8c   : > { %v4196_v31 = vadd.f32 %v2969_v27, %v1425_v28 }
 0xe8d   : > { %3509 = vmatpush3.bf16.msra.mxu0 %v3508_v39 }
 0xe8e   : > { %v1434_v32 = vsel %vm355_vm1, %v4196_v31, 0.0  ;;  %3510 = vmatprep.subr.bf16.mxu0 %v3758_v3 }
 0xe8f   : > { %1435 = vadd.xlane.f32.xlu0 %v1434_v32 }
 0xe91   : > { %3512 = vmatpush3.bf16.msra.mxu0 %v3511_v43 }
 0xe92   : > { %3283 = vmatprep.subr.mxu0 %v3760_v56 }
 0xf1c   : > { %v1436_v44 = vpop.xlane.xlu0 %1435 }
 0xf1d   : > { %v1437_v34 = vmul.f32 0.03125, %v1436_v44 }
 0xf1f   : > { %v1438_v35 = vsub.f32 %v4196_v31, %v1437_v34 }
 0xf21   : > { %v1439_v36 = vmul.f32 %v1438_v35, %v1438_v35 }
 0xf23   : > { %v1440_v37 = vsel %vm355_vm1, %v1439_v36, 0.0 }
 0xf24   : > { %1441 = vadd.xlane.f32.xlu1 %v1440_v37 }
 0xfb1   : > { %v1442_v45 = vpop.xlane.xlu1 %1441 }
 0xfb2   : > { %v1443_v46 = vmul.f32 0.03125, %v1442_v45 }
 0xfb4   : > { %v1444_v47 = vadd.f32 1e-06, %v1443_v46 }
 0xfb6   : > { %3668 = vrsqrt.f32 %v1444_v47 }
 0xfc0   : > { %v3669_v48 = vpop.eup %3668 }
 0xfc1   : > { %v1446_v50 = vmul.f32 %v3669_v48, %v1438_v35 }
 0xfc3   : > { %v1451_v52 = vmul.f32 %v2970_v49, %v1446_v50 }
 0xfc5   : > { %v1456_v53 = vadd.f32 %v2971_v51, %v1451_v52  ;;  %v2994_v52 = vld [vmem:[%s4540_s1 + $0x100] sm:$0xff] }
 0xfc7   : > { %3281 = vmatmul.mubr.msk.f32.vlgmr.msra.gmra.mrb[4].mxu0 %vm389_vm3, %v1456_v53  ;;  %v2995_v53 = vld [vmem:[%s4540_s1 + $0x108] sm:$0xff] }
 0xfc8   : > { %3285 = vmatprep.mubr.msk.f32.mxu0 %vm3759_vm2, %v3760_v56 }
0x109a   : > { %v1536_v55 = vpop.f32.mrb[4].mxu0 }
0x109b   : > { %v1537_v57 = vadd.f32 %v2976_v54, %v1536_v55  ;;  %v3282_v58 = vpop.f32.mrb[5].mxu0  ;;  %v2996_v54 = vld [vmem:[%s4540_s1 + $0x110] sm:$0xff]  ;;  %v3514_v55 = vpack.c.bf16 %v2995_v53, %v2994_v52 }
0x109c   : > { %v3022_v53 = vld [vmem:[%s4540_s1 + $0x1b0] sm:$0xff] }
0x109d   : > { %1635 = vrot.lane.b32.xlu1 %v1537_v57, %s3763_s23  ;;  %1541 = vrot.lane.b32.xlu0 %v1537_v57, %s3762_s17  ;;  %s4557_s17 = smov 80   ;;  %s4558_s23 = smov 104  }
0x10a1   : > { %1633 = vrot.lane.b32.xlu1 %v1537_v57, %s3761_s16  ;;  %s4556_s16 = smov 72  }
0x110f   : > { %v1542_v59 = vpop.permute.xlu0 %1541  ;;  %v1636_v61 = vpop.permute.xlu1 %1635 }
0x1110   : > { %3284 = vmatpush3.xpose.msk.msra.mxu0 %vm466_vm4, %v1542_v59 }
0x1111   : > { %3288 = vmatprep.subr.mxu0 %v3760_v56 }
0x1113   : > { %3286 = vmatmul.mubr.msk.f32.vlgmr.msra.gmra.mrb[6].mxu0 %vm466_vm4, %v1537_v57  ;;  %v1634_v62 = vpop.permute.xlu1 %1633 }
0x1114   : > { %3289 = vmatpush3.xpose.msk.msra.mxu0 %vm466_vm4, %v1636_v61  ;;  %3290 = vmatprep.mubr.msk.f32.mxu0 %vm3759_vm2, %v3760_v56 }
0x1115   : > { %3293 = vmatprep.subr.mxu0 %v3760_v56 }
0x1117   : > { %3291 = vmatmul.mubr.msk.f32.vlgmr.msra.gmra.mrb[8].mxu0 %vm466_vm4, %v1634_v62 }
0x1118   : > { %3295 = vmatprep.mubr.msk.f32.mxu0 %vm3759_vm2, %v3760_v56 }
0x11e6   : > { %v1613_v63 = vpop.f32.mrb[6].mxu0 }
0x11e7   : > { %v1617_v0 = vmul.f32 0.35355338, %v1613_v63  ;;  %v3287_v1 = vpop.f32.mrb[7].mxu0 }
0x11e9   : > { %v1618_v2 = vsel %vm542_vm5, %v1617_v0, -inf }
0x11ea   : > { %1619 = vmax.xlane.f32.xlu1 %v1618_v2  ;;  %v1707_v4 = vpop.f32.mrb[8].mxu0 }
0x11eb   : > { %v1711_v5 = vmul.f32 0.35355338, %v1707_v4  ;;  %v3292_v6 = vpop.f32.mrb[9].mxu0 }
0x11ec   : > { %v2999_v6 = vld [vmem:[%s4542_s3 + $0x13] ss:$0 sm:$0xff] }
0x11ed   : > { %v1712_v7 = vsel %vm542_vm5, %v1711_v5, -inf }
0x11ee   : > { %1713 = vmax.xlane.f32.xlu0 %v1712_v7 }
0x11fb   : > { %1629 = vrot.lane.b32.xlu1 %v1537_v57, %s3765_s26 }
0x11ff   : > { %1876 = vrot.lane.b32.xlu1 %v1537_v57, %s3766_s30  ;;  %s3041_s30 = sshll.u32 %s3821_s22, 6 }
0x1200   : > { %s4498_s10 = scalar_lea.hbm %s4543_s4, %s3041_s30 }
0x1203   : > { %2046 = vrot.lane.b32.xlu1 %v1537_v57, %s4556_s16 }
0x1277   : > { %v1620_v8 = vpop.xlane.xlu1 %1619 }
0x1278   : > { %v1621_v9 = vsub.f32 %v1617_v0, %v1620_v8 }
0x127a   : > { %v1622_v14 = vmul.f32 1.442695, %v1621_v9 }
0x127b   : > { %v4246_v10 = vpop.permute.xlu1 %1629  ;;  %v1714_v11 = vpop.xlane.xlu0 %1713 }
0x127c   : > { %v1715_v12 = vsub.f32 %v1711_v5, %v1714_v11  ;;  %v1723_v13 = vsel %vm4018_vm8, %v4246_v10, 0.0  ;;  %v1632_v28 = vsel %vm342_vm11, %v4246_v10, 0.0  ;;  %v1966_v44 = vsel %vm4040_vm14, %v4246_v10, 0.0 }
0x127d   : > { %3294 = vmatpush3.msk.msra.mxu0 %vm653_vm9, %v1723_v13  ;;  %v2134_v0 = vsel %vm4064_vm7, %v4246_v10, 0.0 }
0x127e   : > { %v1716_v15 = vmul.f32 1.442695, %v1715_v12  ;;  %3298 = vmatprep.subr.mxu0 %v3760_v56 }
0x127f   : > { %v1877_v16 = vpop.permute.xlu1 %1876 }
0x1280   : > { %3670 = vpow2.f32 %v1716_v15 }
0x1281   : > { %3672 = vpow2.f32 %v1622_v14 }
0x1283   : > { %v2047_v17 = vpop.permute.xlu1 %2046 }
0x1284   : > { %3314 = vmatpush3.xpose.msk.msra.mxu1 %vm466_vm4, %v2047_v17 }
0x1285   : > { %3513 = vmatprep.subr.bf16.mxu1 %v3758_v3 }
0x128a   : > { %v3671_v18 = vpop.eup %3670 }
0x128b   : > { %v1718_v19 = vsel %vm542_vm5, %v3671_v18, 0.0  ;;  %v3673_v20 = vpop.eup %3672 }
0x128c   : > { %1719 = vadd.xlane.f32.xlu0 %v1718_v19  ;;  %v1624_v33 = vsel %vm542_vm5, %v3673_v20, 0.0  ;;  %v3005_v19 = vld [vmem:[%s4540_s1 + $0x138] sm:$0xff] }
0x1290   : > { %1625 = vadd.xlane.f32.xlu0 %v1624_v33  ;;  %v3008_v33 = vld [vmem:[%s4540_s1 + $0x140] sm:$0xff] }
0x12a6   : > { %1878 = vrot.lane.b32.xlu0 %v1537_v57, %s4557_s17  ;;  %s216_s17 = sand.u32 1, %s3748_s19  }
0x12a7   : > { %s2837_s11 = scalar_lea.sflag [#allocation3], %s216_s17 }
0x12aa   : > { %2044 = vrot.lane.b32.xlu0 %v1537_v57, %s4558_s23  ;;  %v2997_v57 = vld [vmem:[%s4540_s1 + $0x118] sm:$0xff]  ;;  %s2938_s23 = sshll.u32 %s216_s17, 2 }
0x12ab   : > { %v3517_v58 = vpack.c.bf16 %v2997_v57, %v2996_v54  ;;  %v3023_v54 = vld [vmem:[%s4540_s1 + $0x1b8] sm:$0xff]  ;;  %v3006_v57 = vld [vmem:[%s4542_s3 + $0x16] ss:$0 sm:$0xff]  ;;  %s218_s26 = scalar_lea.vmem [#allocation2], %s2938_s23 }
0x12ac   : > { %s2853_s7 = sshll.u32 %s218_s26, 4  ;;  %s2854_s7 = int_to_ptr.vmem [resolvable:$true] %s2853_s7 }
0x12ad   : > { %s3694_s12 = scalar_lea.vmem %s2854_s7, 64  ;;  %p3701_p0 = scmp.lt.s32.totalorder %s2854_s7, %s3699_s15 }
0x12ae   : > { %p3695_p11 = scmp.ne.s32.totalorder %s2854_s7, %s3694_s12  ;;  %p3702_p1 = scmp.lt.s32.totalorder %s3700_s25, %s3694_s12 }
0x12b0   : > { %p3696_p12 = pnand %p3695_p11, %p3838_p5  ;;  %p3703_p2 = por %p3702_p1, %p3701_p0 }
0x12b2   : > { %p3697_p13 = pneg %p3696_p12 }
0x12b4   : > { %p3704_p3 = pnand %p3703_p2, %p3697_p13 }
0x1319   : > { %v1720_v21 = vpop.xlane.xlu0 %1719 }
0x131a   : > { %3674 = vrcp.f32 %v1720_v21  ;;  %v3009_v21 = vld [vmem:[%s4540_s1 + $0x148] sm:$0xff] }
0x131d   : > { %v1626_v22 = vpop.xlane.xlu0 %1625 }
0x131e   : > { %3676 = vrcp.f32 %v1626_v22  ;;  %v3526_v22 = vpack.c.bf16 %v3009_v21, %v3008_v33  ;;  %v2533_v33 = vld [vmem:[%s4541_s2 + $0xd8] sm:$0xff] }
0x1321   : > { %v1879_v23 = vpop.permute.xlu0 %1878 }
0x1324   : > { %v3675_v25 = vpop.eup %3674 }
0x1325   : > { %v1722_v26 = vmul.f32 %v3675_v25, %v3671_v18  ;;  %v2045_v27 = vpop.permute.xlu0 %2044  ;;  %v3004_v18 = vld [vmem:[%s4540_s1 + $0x130] sm:$0xff] }
0x1326   : > { %3316 = vmatmul.mubr.msk.f32.vlgmr.msra.gmra.mrb[16].mxu1 %vm466_vm4, %v2045_v27 }
0x1327   : > { %3296 = vmatmul.mubr.msk.f32.vlgmr.msra.gmra.mrb[10].mxu0 %vm649_vm10, %v1722_v26  ;;  %3331 = vmatprep.mubr.msk.f32.mxu1 %vm3759_vm2, %v3760_v56 }
0x1328   : > { %3299 = vmatpush3.msk.msra.mxu0 %vm653_vm9, %v1632_v28  ;;  %3300 = vmatprep.mubr.msk.f32.mxu0 %vm3759_vm2, %v3760_v56  ;;  %v3677_v29 = vpop.eup %3676  ;;  %v3000_v28 = vld [vmem:[%s4542_s3 + $0x14] ss:$0 sm:$0xff] }
0x1329   : > { %3303 = vmatprep.subr.mxu0 %v3760_v56  ;;  %v1628_v32 = vmul.f32 %v3677_v29, %v3673_v20  ;;  %3515 = vmatpush3.bf16.msra.mxu1 %v3514_v55  ;;  %v3523_v20 = vpack.c.bf16 %v3005_v19, %v3004_v18  ;;  %v3547_v55 = vpack.c.bf16 %v3023_v54, %v3022_v53  ;;  %v2530_v18 = vld [vmem:[%s4541_s2 + $0xc0] sm:$0xff] }
0x132a   : > { %3516 = vmatprep.subr.bf16.mxu1 %v3758_v3 }
0x132d   : > { %3518 = vmatpush3.bf16.msra.mxu1 %v3517_v58 }
0x132e   : > { %3525 = vmatprep.subr.bf16.mxu1 %v3758_v3 }
0x132f   : > { %3301 = vmatmul.mubr.msk.f32.vlgmr.msra.gmra.mrb[10].mxu0 %vm649_vm10, %v1628_v32  ;;  %v3001_v32 = vld [vmem:[%s4542_s3 + $0x15] ss:$0 sm:$0xff] }
0x1330   : > { %3304 = vmatpush3.xpose.msk.msra.mxu0 %vm466_vm4, %v1879_v23  ;;  %3305 = vmatprep.mubr.msk.f32.mxu0 %vm3759_vm2, %v3760_v56 }
0x1331   : > { %3308 = vmatprep.subr.mxu0 %v3760_v56 }
0x1333   : > { %3306 = vmatmul.mubr.msk.f32.vlgmr.msra.gmra.mrb[12].mxu0 %vm466_vm4, %v1877_v16  ;;  %v3002_v16 = vld [vmem:[%s4540_s1 + $0x120] sm:$0xff]  ;;  %vm4446_vm4 = vmpackc.low %vm389_vm3, %vm389_vm3 }
0x1334   : > { %3309 = vmatpush3.msk.msra.mxu0 %vm653_vm9, %v1966_v44  ;;  %3310 = vmatprep.mubr.msk.f32.mxu0 %vm3759_vm2, %v3760_v56 }
0x1335   : > { %3318 = vmatprep.subr.mxu0 %v3760_v56 }
0x13f9   : > { %v2118_v34 = vpop.f32.mrb[16].mxu1 }
0x13fa   : > { %v2122_v35 = vmul.f32 0.35355338, %v2118_v34  ;;  %v3317_v36 = vpop.f32.mrb[17].mxu1 }
0x13fb   : > { %v3011_v36 = vld [vmem:[%s4540_s1 + $0x158] sm:$0xff] }
0x13fc   : > { %v2123_v37 = vsel %vm542_vm5, %v2122_v35, -inf }
0x13fd   : > { %2124 = vmax.xlane.f32.xlu0 %v2123_v37 }
0x1406   : > { %v1950_v38 = vpop.f32.mrb[12].mxu0 }
0x1407   : > { %v1954_v24 = vmul.f32 0.35355338, %v1950_v38  ;;  %v3307_v39 = vpop.f32.mrb[13].mxu0  ;;  %v3012_v38 = vld [vmem:[%s4540_s1 + $0x160] sm:$0xff] }
0x1409   : > { %v1955_v40 = vsel %vm542_vm5, %v1954_v24, -inf }
0x140a   : > { %1956 = vmax.xlane.f32.xlu1 %v1955_v40  ;;  %v3014_v40 = vld [vmem:[%s4540_s1 + $0x170] sm:$0xff] }
0x148a   : > { %v2125_v42 = vpop.xlane.xlu0 %2124 }
0x148b   : > { %v2126_v41 = vsub.f32 %v2122_v35, %v2125_v42  ;;  %v3010_v35 = vld [vmem:[%s4540_s1 + $0x150] sm:$0xff]  ;;  %v3015_v42 = vld [vmem:[%s4540_s1 + $0x178] sm:$0xff] }
0x148c   : > { %v3529_v37 = vpack.c.bf16 %v3011_v36, %v3010_v35  ;;  %v2613_v35 = vld [vmem:[%s4541_s2 + $0xe8] sm:$0xff] }
0x148d   : > { %v2127_v43 = vmul.f32 1.442695, %v2126_v41  ;;  %v3535_v41 = vpack.c.bf16 %v3015_v42, %v3014_v40  ;;  %v3027_v40 = vld [vmem:[%s4542_s3 + $0x3] ss:$0 sm:$0xff] }
0x148f   : > { %3678 = vpow2.f32 %v2127_v43  ;;  %v3016_v43 = vld [vmem:[%s4540_s1 + $0x180] sm:$0xff] }
0x1497   : > { %v1957_v45 = vpop.xlane.xlu1 %1956 }
0x1498   : > { %v1958_v46 = vsub.f32 %v1954_v24, %v1957_v45  ;;  %v3013_v24 = vld [vmem:[%s4540_s1 + $0x168] sm:$0xff] }
0x1499   : > { %v3679_v47 = vpop.eup %3678  ;;  %v3532_v39 = vpack.c.bf16 %v3013_v24, %v3012_v38  ;;  %v3017_v45 = vld [vmem:[%s4540_s1 + $0x188] sm:$0xff]  ;;  %v2614_v38 = vld [vmem:[%s4541_s2 + $0xf0] sm:$0xff]  ;;  %v2615_v24 = vld [vmem:[%s4541_s2 + $0xf8] sm:$0xff] }
0x149a   : > { %v1959_v48 = vmul.f32 1.442695, %v1958_v46  ;;  %v2129_v49 = vsel %vm542_vm5, %v3679_v47, 0.0  ;;  %v3018_v46 = vld [vmem:[%s4540_s1 + $0x190] sm:$0xff] }
0x149b   : > { %2130 = vadd.xlane.f32.xlu1 %v2129_v49 }
0x149c   : > { %3680 = vpow2.f32 %v1959_v48  ;;  %v3019_v48 = vld [vmem:[%s4540_s1 + $0x198] sm:$0xff] }
0x149d   : > { %v3541_v49 = vpack.c.bf16 %v3019_v48, %v3018_v46  ;;  %v2617_v48 = vld [vmem:[%s4541_s2 + $0x108] sm:$0xff] }
0x14a6   : > { %v3681_v50 = vpop.eup %3680 }
0x14a7   : > { %v1961_v51 = vsel %vm542_vm5, %v3681_v50, 0.0 }
0x14a8   : > { %1962 = vadd.xlane.f32.xlu0 %v1961_v51  ;;  %v3021_v51 = vld [vmem:[%s4540_s1 + $0x1a8] sm:$0xff] }
0x1528   : > { %v2131_v61 = vpop.xlane.xlu1 %2130 }
0x1535   : > { %v1963_v59 = vpop.xlane.xlu0 %1962 }
0x1536   : > { %3682 = vrcp.f32 %v1963_v59 }
0x1537   : > { %3684 = vrcp.f32 %v2131_v61 }
0x1540   : > { %v3683_v62 = vpop.eup %3682 }
0x1541   : > { %v1965_v63 = vmul.f32 %v3683_v62, %v3681_v50  ;;  %v3685_v1 = vpop.eup %3684  ;;  %v3020_v50 = vld [vmem:[%s4540_s1 + $0x1a0] sm:$0xff] }
0x1542   : > { %v2133_v2 = vmul.f32 %v3685_v1, %v3679_v47  ;;  %v3538_v47 = vpack.c.bf16 %v3017_v45, %v3016_v43  ;;  %v3544_v52 = vpack.c.bf16 %v3021_v51, %v3020_v50  ;;  %v2618_v50 = vld [vmem:[%s4541_s2 + $0x110] sm:$0xff]  ;;  %v2619_v51 = vld [vmem:[%s4541_s2 + $0x118] sm:$0xff] }
0x1543   : > { %3311 = vmatmul.mubr.msk.f32.vlgmr.msra.gmra.mrb[10].mxu0 %vm649_vm10, %v1965_v63 }
0x1544   : > { %3319 = vmatpush3.msk.msra.mxu0 %vm653_vm9, %v2134_v0  ;;  %3320 = vmatprep.mubr.msk.f32.mxu0 %vm3759_vm2, %v3760_v56 }
0x1545   : > { %3519 = vmatprep.subr.bf16.mxu0 %v3758_v3 }
0x154b   : > { %3321 = vmatmul.mubr.msk.f32.vlgmr.msra.gmra.mrb[10].mxu0 %vm649_vm10, %v2133_v2 }
0x154c   : > { %3342 = vmatprep.mubr.msk.f32.mxu0 %vm3759_vm2, %v3760_v56 }
0x161e   : > { %v2207_v4 = vpop.f32.mrb[10].mxu0 }
0x161f   : > { %v3322_v5 = vpop.f32.mrb[11].mxu0  ;;  %3332 = vmatmul.mubr.msk.f32.vlgmr.msra.gmra.mrb[18].mxu1 %vm389_vm3, %v2207_v4 }
0x1620   : > { %3377 = vmatprep.mubr.msk.f32.mxu1 %vm3759_vm2, %v3760_v56  ;;  %3527 = vmatpush3.bf16.msra.mxu1 %v3526_v22 }
0x1621   : > { %3528 = vmatprep.subr.bf16.mxu1 %v3758_v3 }
0x1624   : > { %3530 = vmatpush3.bf16.msra.mxu1 %v3529_v37 }
0x1625   : > { %3531 = vmatprep.subr.bf16.mxu1 %v3758_v3 }
0x1628   : > { %3533 = vmatpush3.bf16.msra.mxu1 %v3532_v39  ;;  %v3560_v39 = vpack.c.bf16 %v2615_v24, %v2614_v38 }
0x1629   : > { %3534 = vmatprep.subr.bf16.mxu1 %v3758_v3 }
0x162c   : > { %3536 = vmatpush3.bf16.msra.mxu1 %v3535_v41 }
0x162d   : > { %3537 = vmatprep.subr.bf16.mxu1 %v3758_v3 }
0x1630   : > { %3539 = vmatpush3.bf16.msra.mxu1 %v3538_v47  ;;  %v2616_v47 = vld [vmem:[%s4541_s2 + $0x100] sm:$0xff] }
0x1631   : > { %3540 = vmatprep.subr.bf16.mxu1 %v3758_v3 }
0x1634   : > { %3542 = vmatpush3.bf16.msra.mxu1 %v3541_v49  ;;  %v3564_v49 = vpack.c.bf16 %v2617_v48, %v2616_v47 }
0x1635   : > { %3543 = vmatprep.subr.bf16.mxu1 %v3758_v3 }
0x1638   : > { %3545 = vmatpush3.bf16.msra.mxu1 %v3544_v52  ;;  %v3568_v52 = vpack.c.bf16 %v2619_v51, %v2618_v50 }
0x1639   : > { %3546 = vmatprep.subr.bf16.mxu1 %v3758_v3 }
0x163c   : > { %3548 = vmatpush3.bf16.msra.mxu1 %v3547_v55 }
0x163d   : > { %3571 = vmatprep.subr.bf16.mxu1 %v3758_v3 }
0x16f2   : > { %v2285_v60 = vpop.f32.mrb[18].mxu1 }
0x16f3   : > { %v2289_v7 = vadd.f32 %v2285_v60, %v4196_v31  ;;  %v3333_v8 = vpop.f32.mrb[19].mxu1  ;;  %v3003_v31 = vld [vmem:[%s4540_s1 + $0x128] sm:$0xff] }
0x16f4   : > { %v3520_v17 = vpack.c.bf16 %v3003_v31, %v3002_v16  ;;  %v3024_v8 = vld [vmem:[%s4542_s3 + $0x17] ss:$0 sm:$0xff] }
0x16f5   : > { %v4319_v9 = vadd.f32 %v2999_v6, %v2289_v7 }
0x16f6   : > { %3521 = vmatpush3.bf16.msra.mxu0 %v3520_v17 }
0x16f7   : > { %v2298_v10 = vsel %vm355_vm1, %v4319_v9, 0.0  ;;  %3522 = vmatprep.subr.bf16.mxu0 %v3758_v3 }
0x16f8   : > { %2299 = vadd.xlane.f32.xlu0 %v2298_v10 }
0x16fa   : > { %3524 = vmatpush3.bf16.msra.mxu0 %v3523_v20  ;;  %v2532_v20 = vld [vmem:[%s4541_s2 + $0xd0] sm:$0xff] }
0x16fb   : > { %3549 = vmatprep.subr.bf16.mxu0 %v3758_v3  ;;  %v3553_v21 = vpack.c.bf16 %v2533_v33, %v2532_v20 }
0x1785   : > { %v2300_v11 = vpop.xlane.xlu0 %2299 }
0x1786   : > { %v2301_v12 = vmul.f32 0.03125, %v2300_v11 }
0x1788   : > { %v2302_v13 = vsub.f32 %v4319_v9, %v2301_v12 }
0x178a   : > { %v2303_v14 = vmul.f32 %v2302_v13, %v2302_v13 }
0x178c   : > { %v2304_v15 = vsel %vm355_vm1, %v2303_v14, 0.0 }
0x178d   : > { %2305 = vadd.xlane.f32.xlu1 %v2304_v15 }
0x181a   : > { %v2306_v23 = vpop.xlane.xlu1 %2305 }
0x181b   : > { %v2307_v25 = vmul.f32 0.03125, %v2306_v23 }
0x181d   : > { %v2308_v26 = vadd.f32 1e-06, %v2307_v25 }
0x181f   : > { %3686 = vrsqrt.f32 %v2308_v26 }
0x1829   : > { %v3687_v27 = vpop.eup %3686 }
0x182a   : > { %v2310_v29 = vmul.f32 %v3687_v27, %v2302_v13  ;;  %v3025_v27 = vld [vmem:[%s4542_s3 + $0x1] ss:$0 sm:$0xff] }
0x182c   : > { %v2315_v44 = vmul.f32 %v3000_v28, %v2310_v29  ;;  %v3026_v29 = vld [vmem:[%s4542_s3 + $0x2] ss:$0 sm:$0xff] }
0x182e   : > { %v2320_v34 = vadd.f32 %v3001_v32, %v2315_v44 }
0x1830   : > { %3343 = vmatmul.mubr.msk.f32.vlgmr.msra.gmra.mrb[14].mxu0 %vm389_vm3, %v2320_v34  ;;  %v2612_v34 = vld [vmem:[%s4541_s2 + $0xe0] sm:$0xff] }
0x1831   : > { %3388 = vmatprep.mubr.msk.f32.mxu0 %vm3759_vm2, %v3760_v56  ;;  %v3556_v37 = vpack.c.bf16 %v2613_v35, %v2612_v34 }
0x1903   : > { %v2399_v58 = vpop.f32.mrb[14].mxu0 }
0x1904   : > { %v2400_v59 = vadd.f32 %v3006_v57, %v2399_v58  ;;  %v3344_v61 = vpop.f32.mrb[15].mxu0 }
0x1906   : > { %v2403_v62 = vmul.f32 %v2400_v59, %v2400_v59 }
0x1908   : > { %v2404_v63 = vmul.f32 %v2403_v62, %v2400_v59 }
0x190a   : > { %v2405_v0 = vmul.f32 0.044715, %v2404_v63 }
0x190c   : > { %v2406_v1 = vadd.f32 %v2405_v0, %v2400_v59 }
0x190e   : > { %v2407_v2 = vmul.f32 0.7978846, %v2406_v1 }
0x1910   : > { %3688 = vtanh.f32 %v2407_v2 }
0x191a   : > { %v3689_v4 = vpop.eup %3688 }
0x191b   : > { %v2409_v5 = vadd.f32 1.0, %v3689_v4 }
0x191d   : > { %v2410_v60 = vmul.f32 0.5, %v2409_v5 }
0x191f   : > { %v2411_v6 = vmul.f32 %v2410_v60, %v2400_v59 }
0x1921   : > { %3378 = vmatmul.mubr.f32.vlgmr.msra.gmra.mrb[20].mxu1 %v2411_v6 }
0x1922   : > { %3426 = vmatprep.mubr.msk.f32.mxu1 %vm3759_vm2, %v3760_v56  ;;  %3573 = vmatpush3.bf16.msra.mxu1 %v3556_v37 }
0x1923   : > { %3574 = vmatprep.subr.bf16.mxu1 %v3758_v3 }
0x1926   : > { %3576 = vmatpush3.bf16.msra.mxu1 %v3560_v39 }
0x1927   : > { %3577 = vmatprep.subr.bf16.mxu1 %v3758_v3 }
0x192a   : > { %3579 = vmatpush3.bf16.msra.mxu1 %v3564_v49 }
0x192b   : > { %3580 = vmatprep.subr.bf16.mxu1 %v3758_v3 }
0x192e   : > { %3582 = vmatpush3.bf16.msra.mxu1 %v3568_v52 }
0x19f4   : > { %v2494_v7 = vpop.f32.mrb[20].mxu1 }
0x19f5   : > { %v2498_v10 = vadd.f32 %v2494_v7, %v4319_v9  ;;  %v3379_v11 = vpop.f32.mrb[21].mxu1  ;;  %v2531_v9 = vld [vmem:[%s4541_s2 + $0xc8] sm:$0xff] }
0x19f6   : > { %v3550_v19 = vpack.c.bf16 %v2531_v9, %v2530_v18 }
0x19f7   : > { %v2504_v12 = vadd.f32 %v3024_v8, %v2498_v10 }
0x19f8   : > { %3551 = vmatpush3.bf16.msra.mxu0 %v3550_v19 }
0x19f9   : > { %v2507_v13 = vsel %vm355_vm1, %v2504_v12, 0.0  ;;  %3552 = vmatprep.subr.bf16.mxu0 %v3758_v3 }
0x19fa   : > { %2508 = vadd.xlane.f32.xlu0 %v2507_v13 }
0x19fc   : > { %3554 = vmatpush3.bf16.msra.mxu0 %v3553_v21 }
0x19fd   : > { %3555 = vmatprep.subr.bf16.mxu0 %v3758_v3 }
0x1a87   : > { %v2509_v14 = vpop.xlane.xlu0 %2508 }
0x1a88   : > { %v2510_v15 = vmul.f32 0.03125, %v2509_v14 }
0x1a8a   : > { %v2511_v16 = vsub.f32 %v2504_v12, %v2510_v15 }
0x1a8c   : > { %v2512_v31 = vmul.f32 %v2511_v16, %v2511_v16 }
0x1a8e   : > { %v2513_v17 = vsel %vm355_vm1, %v2512_v31, 0.0 }
0x1a8f   : > { %2514 = vadd.xlane.f32.xlu1 %v2513_v17 }
0x1b1c   : > { %v2515_v22 = vpop.xlane.xlu1 %2514 }
0x1b1d   : > { %v2516_v23 = vmul.f32 0.03125, %v2515_v22 }
0x1b1f   : > { %v2517_v25 = vadd.f32 1e-06, %v2516_v23 }
0x1b21   : > { %3690 = vrsqrt.f32 %v2517_v25 }
0x1b2b   : > { %v3691_v26 = vpop.eup %3690 }
0x1b2c   : > { %v2519_v28 = vmul.f32 %v3691_v26, %v2511_v16 }
0x1b2e   : > { %v2524_v32 = vmul.f32 %v3025_v27, %v2519_v28 }
0x1b30   : > { %v2529_v44 = vadd.f32 %v3026_v29, %v2524_v32 }
0x1b32   : > { %3389 = vmatmul.mubr.msk.f32.vlgmr.msra.gmra.mrb[16].mxu0 %vm389_vm3, %v2529_v44 }
0x1b33   : > { %3407 = vmatprep.mubr.msk.f32.mxu0 %vm3759_vm2, %v3760_v56  ;;  %3558 = vmatpush3.bf16.xpose.msk.msra.mxu0 %vm4446_vm4, %v3556_v37  ;;  %vm2724_vm2 = vcmask 519168  }
0x1b34   : > { %3559 = vmatprep.subr.bf16.mxu0 %v3758_v3 }
0x1b3b   : > { %3562 = vmatpush3.bf16.xpose.msk.msra.mxu0 %vm4446_vm4, %v3560_v39 }
0x1b3c   : > { %3563 = vmatprep.subr.bf16.mxu0 %v3758_v3 }
0x1b43   : > { %3566 = vmatpush3.bf16.xpose.msk.msra.mxu0 %vm4446_vm4, %v3564_v49 }
0x1b44   : > { %3567 = vmatprep.subr.bf16.mxu0 %v3758_v3 }
0x1b4b   : > { %3570 = vmatpush3.bf16.xpose.msk.msra.mxu0 %vm4446_vm4, %v3568_v52 }
0x1c05   : > { %v2608_v42 = vpop.f32.mrb[16].mxu0 }
0x1c06   : > { %v2609_v41 = vadd.f32 %v3027_v40, %v2608_v42  ;;  %v3390_v43 = vpop.f32.mrb[17].mxu0 }
0x1c08   : > { %v2620_v45 = vmul.f32 %v2609_v41, %v2609_v41 }
0x1c0a   : > { %v2621_v46 = vsel %vm355_vm1, %v2620_v45, 0.0 }
0x1c0b   : > { %2622 = vadd.xlane.f32.xlu0 %v2621_v46 }
0x1c98   : > { %v2623_v53 = vpop.xlane.xlu0 %2622 }
0x1c99   : > { %v2624_v54 = vadd.f32 1e-12, %v2623_v53 }
0x1c9b   : > { %3692 = vrsqrt.f32 %v2624_v54 }
0x1ca5   : > { %v3693_v55 = vpop.eup %3692 }
0x1ca6   : > { %v2626_v57 = vmul.f32 %v3693_v55, %v2609_v41 }
0x1ca8   : > { %3408 = vmatmul.mubr.msk.f32.vlgmr.msra.gmra.mrb[18].mxu0 %vm389_vm3, %v2626_v57 }
0x1d7b   : > { %v2720_v58 = vpop.f32.mrb[18].mxu0 }
0x1d7c   : > { %v3409_v59 = vpop.f32.mrb[19].mxu0  ;;  %v2725_v61 = vsel %vm2724_vm2, %v2720_v58, -inf }
0x1d7d   : > { %2726 = vmax.xlane.f32.xlu1 %v2725_v61 }
0x1e0a   : > { %v2727_v62 = vpop.xlane.xlu1 %2726 }
0x1e0b   : > { %vm2728_vm5 = vcmp.ge.f32.partialorder %v2720_v58, %v2727_v62 }
0x1e0c   : > { %v2729_v3 = vsel %vm2728_vm5, %v4014_v30, 64 }
0x1e0d   : > { %v2730_v63 = vsel %vm2724_vm2, %v2729_v3, 2147483647 }
0x1e0e   : > { %v2732_v0 = vshra.s32 %v2730_v63, 16  ;;  %v2731_v2 = vand.u32 65535, %v2730_v63 }
0x1e10   : > { %v2734_v1 = vcvt.s32.f32 %v2732_v0  ;;  %v2733_v5 = vcvt.s32.f32 %v2731_v2 }
0x1e12   : > { %2735 = vmin.xlane.f32.xlu0 %v2734_v1 }
0x1e9f   : > { %v2736_v4 = vpop.xlane.xlu0 %2735 }
0x1ea0   : > { %vm2737_vm8 = vcmp.eq.f32.partialorder %v2734_v1, %v2736_v4  ;;  %v2742_v6 = vcvt.f32.s32 %v2736_v4 }
0x1ea1   : > { %v2738_v60 = vsel %vm2737_vm8, %v2733_v5, inf }
0x1ea2   : > { %2739 = vmin.xlane.f32.xlu1 %v2738_v60  ;;  %v2743_v8 = vshll.u32 %v2742_v6, 16 }
0x1f2f   : > { %v2740_v7 = vpop.xlane.xlu1 %2739 }
0x1f30   : > { %v2741_v10 = vcvt.f32.s32 %v2740_v7 }
0x1f32   : > { %v2744_v11 = vadd.s32 %v2743_v8, %v2741_v10 }
0x1f34   : > { %vm2745_vm3 = vcmp.eq.s32.totalorder %v4014_v30, %v2744_v11 }
0x1f35   : > { %v3038_v12 = vsel %vm2745_vm3, 1.0, %v3760_v56 }
0x1f36   : > { %3427 = vmatmul.mubr.msk.f32.vlgmr.msra.gmra.mrb[22].mxu1 %vm264_vm0, %v3038_v12 }
0x2009   : > { %v2817_v13 = vpop.f32.mrb[22].mxu1 }
0x200a   : > { %2821 = vst.msk [vmem:[%s218_s26] sm:$0xf] %vm355_vm1, %v2817_v13  ;;  %v2822_v14 = vsub.f32 %v2817_v13, %v2609_v41  ;;  %v3428_v15 = vpop.f32.mrb[23].mxu1 }
0x200c   : > { %v2823_v16 = vmul.f32 %v2822_v14, %v2822_v14 }
0x200e   : > { %v2824_v31 = vsel %vm355_vm1, %v2823_v16, 0.0 }
0x200f   : > { %2825 = vadd.xlane.f32.xlu0 %v2824_v31 }
0x2010   : > { %3707 = shalt.err (!%p3704_p3)
}
0x2011   : > { %s3708_s22 = scalar_lea.hbm %s4498_s10, 64  ;;  %s3712_s17 = scalar_lea.hbm %s4543_s4, 128 }
0x2012   : > { %p3709_p4 = scmp.ne.s32.totalorder %s4498_s10, %s3708_s22  ;;  %p3713_p9 = scmp.lt.u32.totalorder %s4498_s10, %s4543_s4 }
0x2013   : > { %p3714_p10 = scmp.lt.u32.totalorder %s3712_s17, %s3708_s22  ;;  %p3716_p12 = scmp.lt.u32.totalorder %s3708_s22, %s4498_s10 }
0x2014   : > { %p3710_p7 = pnand %p3709_p4, %p3838_p5 }
0x2015   : > { %p3715_p11 = por %p3714_p10, %p3713_p9 }
0x2016   : > { %p3711_p8 = pneg %p3710_p7 }
0x2017   : > { %p3717_p13 = por %p3716_p12, %p3715_p11 }
0x2019   : > { %p3718_p0 = pnand %p3717_p13, %p3711_p8 }
0x201b   : > { %3721 = shalt.err (!%p3718_p0)
}
0x201c   : > { %3595 = dma.vmem_to_hbm [thread:$0]  (%p3838_p5), %s2854_s7, 64, %s4498_s10, %s2837_s11   ;;  %vm2834_vm0 = vcmask 0  }
0x201d   : > { %s231_s9 = scalar_lea.vmem %s4544_s5, %s3864_s13 }
0x209c   : > { %v2826_v56 = vpop.xlane.xlu0 %2825 }
0x209d   : > { %v2827_v30 = vsel %vm653_vm9, %v2826_v56, 0.0 }
0x209e   : > { %v2828_v17 = vrot.slane %v2827_v30, 4 }
0x20a0   : > { %v2829_v18 = vadd.f32 %v2828_v17, %v2827_v30 }
0x20a2   : > { %v2830_v9 = vrot.slane %v2829_v18, 2 }
0x20a4   : > { %v2831_v19 = vadd.f32 %v2830_v9, %v2829_v18 }
0x20a6   : > { %v2832_v20 = vrot.slane %v2831_v19, 1 }
0x20a8   : > { %v2833_v33 = vadd.f32 %v2832_v20, %v2831_v19 }
0x20aa   : > { %2835 = vst.msk [vmem:[%s231_s9] sm:$0x1] %vm2834_vm0, %v2833_v33 }
0x20ab PF: > { %p3601_p5 = scmp.ge.s32.totalorder %s3756_s21, 2  ;;  %s2868_s28 = sand.u32 1, %s3744_s18  }
0x20ac   : > { %s2869_s7 = scalar_lea.sflag [#allocation3], %s2868_s28 }
0x20ad   : > { %p3598_p1 = pnand %p3601_p5, %p3842_p6 }
0x20af   : > { %3739 = dma.done.wait (!%p3598_p1), %s2869_s7, 64  }
0x20b0   : > { %3741 = vsyncadd (!%p3598_p1), %s2869_s7, 4294967232  ;;  %p16_p2 = scmp.ge.s32.totalorder %s3825_s24, 4   ;;  %s4561_s18 = smov %s3748_s19 }
0x20b1   : > { %s4562_s19 = smov %s3752_s20  ;;  %s4563_s20 = smov %s3836_s27 }
0x20b2   : > { %s4564_s21 = smov %s3825_s24  ;;  %18 = sbr.rel (!%p16_p2) target bundleno = 3 (0x3), region = 84 }
0x20b9   :  { %2880 = vsyncpa [#allocation3], 1 }
0x20ba   :  { %2882 = vsyncpa [#allocation3 + $0x1], 1 }

</bundles_post_ra>
